<compile_context>
chip_gen: v5e
topology: v5e:2x2
jax: 0.10.0
libtpu: 0.0.40
codegen_flags: <defaults>
</compile_context>

<pallas_src>
import functools

import jax
import jax.numpy as jnp
from jax.experimental import pallas as pl
from jax.experimental.pallas import tpu as pltpu


# ----------------------------------------------------------------------------
# helpers
# ----------------------------------------------------------------------------
def _round_up(x, m):
    return ((x + m - 1) // m) * m


def _tile_rows(m, max_tile=512):
    """Pick (padded_M, tile_m).

    tile_m is a multiple of 8 (f32 sublane tiling) and, when possible, the grid
    has >= 2 steps so v7x can shard the 'parallel' row axis across its two
    TensorCores.  Tiles are capped at `max_tile` rows (comfortably inside the
    32 MiB scoped VMEM default even on v7x's 64 MiB VMEM, with double-buffered
    inputs, resident weights and one lane-dense output tile).
    """
    mp = _round_up(max(m, 1), 16)        # multiple of 16 -> mp // 2 is a multiple of 8
    if mp // 2 >= max_tile:
        tile = max_tile
        mp = _round_up(m, tile)
    else:
        tile = max(8, mp // 2)
    return mp, tile


# ----------------------------------------------------------------------------
# Pallas kernel 1: 1x1 conv (input_proj) expressed as a row-tiled matmul.
# Input/output stay in NHWC (tokens-last-channel) so no transposes are needed.
# ----------------------------------------------------------------------------
def _proj_kernel(x_ref, w_ref, b_ref, o_ref):
    y = jnp.dot(x_ref[...], w_ref[...], preferred_element_type=jnp.float32)
    o_ref[...] = (y + b_ref[...]).astype(o_ref.dtype)


def input_proj_1x1(src_nhwc, w_in_out, b_out, *, max_tile=512):
    """1x1 Conv2d on NHWC features: (B, H, W, Cin) -> (B, H, W, Cout)."""
    B, H, W, Cin = src_nhwc.shape
    Cout = w_in_out.shape[1]
    x = src_nhwc.reshape(B * H * W, Cin)
    M = x.shape[0]
    Mp, tile_m = _tile_rows(M, max_tile)
    if Mp != M:
        x = jnp.pad(x, ((0, Mp - M), (0, 0)))
    bias2d = b_out.reshape(1, Cout)

    ce = pl.CostEstimate(
        flops=2 * Mp * Cin * Cout,
        transcendentals=0,
        bytes_accessed=4 * (Mp * Cin + Cin * Cout + Cout + Mp * Cout))

    out = pl.pallas_call(
        _proj_kernel,
        out_shape=jax.ShapeDtypeStruct((Mp, Cout), jnp.float32),
        grid_spec=pltpu.PrefetchScalarGridSpec(
            num_scalar_prefetch=0,
            grid=(Mp // tile_m,),
            in_specs=[
                pl.BlockSpec((tile_m, Cin), lambda i: (i, 0)),
                pl.BlockSpec((Cin, Cout), lambda i: (0, 0)),
                pl.BlockSpec((1, Cout), lambda i: (0, 0)),
            ],
            out_specs=pl.BlockSpec((tile_m, Cout), lambda i: (i, 0)),
        ),
        compiler_params=pltpu.CompilerParams(dimension_semantics=("parallel",)),
        cost_estimate=ce,
    )(x, w_in_out, bias2d)

    if Mp != M:
        out = out[:M]
    return out.reshape(B, H, W, Cout)


# ----------------------------------------------------------------------------
# Pallas kernel 2: fused, head-selectable prediction heads.
#
#   y1 = x @ W1 + b1    with  W1 = [mlp1_layer1 | mlp2_layer1 | lin heads...]
#   class logits        = y1[:, lin columns]
#   box coords (each)   = sigmoid(relu(relu(y1[:, mlp cols]) @ W2 + b2) @ W3 + b3)
#
# Output is ONE lane-dense tile: [lin pieces..., mlp pieces..., zero pad] with
# total width padded up to a multiple of 128 lanes.
# ----------------------------------------------------------------------------
def _heads_kernel(*refs, lin_widths, mlp_hidden, out_width):
    x_ref, w1_ref, b1_ref = refs[0], refs[1], refs[2]
    mlp_refs = refs[3:-1]            # groups of (w2, b2, w3, b3) per box MLP
    out_ref = refs[-1]

    x = x_ref[...]
    # One fused MXU matmul for every first-layer linear that reads x.
    y1 = jnp.dot(x, w1_ref[...], preferred_element_type=jnp.float32) + b1_ref[...]

    pieces = []

    # class-logit heads (no activation); their columns sit after the MLP ones.
    col = sum(mlp_hidden)
    for w in lin_widths:
        pieces.append(y1[:, col:col + w])
        col += w

    # 3-layer box MLPs: Linear -> ReLU -> Linear -> ReLU -> Linear -> sigmoid.
    col = 0
    for m, dh in enumerate(mlp_hidden):
        w2_ref, b2_ref, w3_ref, b3_ref = mlp_refs[4 * m:4 * m + 4]
        h = jnp.maximum(y1[:, col:col + dh], 0.0)
        col += dh
        h = jnp.maximum(
            jnp.dot(h, w2_ref[...], preferred_element_type=jnp.float32) + b2_ref[...],
            0.0)
        o = jnp.dot(h, w3_ref[...], preferred_element_type=jnp.float32) + b3_ref[...]
        pieces.append(jax.nn.sigmoid(o))

    used = sum(pc.shape[1] for pc in pieces)
    if used < out_width:
        pieces.append(jnp.zeros((x.shape[0], out_width - used), jnp.float32))
    out = pieces[0] if len(pieces) == 1 else jnp.concatenate(pieces, axis=-1)
    out_ref[...] = out.astype(out_ref.dtype)


def run_heads(x_flat, p, *, do_obj=True, do_verb=True, do_sub=True,
              do_objbox=True, max_tile=512):
    """x_flat: (M, D) tokens.  Returns dict with the selected heads:
       'obj' (M, C_obj), 'verb' (M, C_verb), 'sub' (M, 4), 'objbox' (M, 4)."""
    M, D = x_flat.shape
    Mp, tile_m = _tile_rows(M, max_tile)
    x_pad = x_flat if Mp == M else jnp.pad(x_flat, ((0, Mp - M), (0, 0)))

    # Build the fused first-layer weight.  MLP hidden columns first so their
    # (wide, lane-aligned at real hidden sizes) slices start at multiples of D.
    mlp_w1, mlp_b1, lin_w1, lin_b1 = [], [], [], []
    lin_widths, lin_names = [], []
    mlp_hidden, mlp_out_widths, mlp_names, mlp_weight_args = [], [], [], []

    if do_obj:
        lin_w1.append(p["w_obj"]); lin_b1.append(p["b_obj"])
        lin_widths.append(p["w_obj"].shape[1]); lin_names.append("obj")
    if do_verb:
        lin_w1.append(p["w_verb"]); lin_b1.append(p["b_verb"])
        lin_widths.append(p["w_verb"].shape[1]); lin_names.append("verb")
    if do_sub:
        mlp_w1.append(p["ws1"]); mlp_b1.append(p["bs1"])
        mlp_hidden.append(p["ws1"].shape[1])
        mlp_out_widths.append(p["ws3"].shape[1]); mlp_names.append("sub")
        mlp_weight_args += [p["ws2"], p["bs2"].reshape(1, -1),
                            p["ws3"], p["bs3"].reshape(1, -1)]
    if do_objbox:
        mlp_w1.append(p["wo1"]); mlp_b1.append(p["bo1"])
        mlp_hidden.append(p["wo1"].shape[1])
        mlp_out_widths.append(p["wo3"].shape[1]); mlp_names.append("objbox")
        mlp_weight_args += [p["wo2"], p["bo2"].reshape(1, -1),
                            p["wo3"], p["bo3"].reshape(1, -1)]

    W1 = jnp.concatenate(mlp_w1 + lin_w1, axis=1)
    b1 = jnp.concatenate(mlp_b1 + lin_b1).reshape(1, -1)

    used_cols = sum(lin_widths) + sum(mlp_out_widths)
    out_width = _round_up(used_cols, 128)        # lane-dense, unmasked stores

    rows = lambda i: (i, 0)
    full = lambda i: (0, 0)

    weight_args = [W1, b1] + mlp_weight_args
    weight_specs = [pl.BlockSpec(w.shape, full) for w in weight_args]

    kernel = functools.partial(
        _heads_kernel,
        lin_widths=tuple(lin_widths),
        mlp_hidden=tuple(mlp_hidden),
        out_width=out_width)

    flops = 2 * Mp * D * W1.shape[1]
    for i in range(len(mlp_hidden)):
        w2, _, w3, _ = mlp_weight_args[4 * i:4 * i + 4]
        flops += 2 * Mp * (w2.size + w3.size)
    ce = pl.CostEstimate(
        flops=int(flops),
        transcendentals=int(Mp * sum(mlp_out_widths)),
        bytes_accessed=int(4 * (Mp * D + Mp * out_width
                                + sum(w.size for w in weight_args))))

    out = pl.pallas_call(
        kernel,
        out_shape=jax.ShapeDtypeStruct((Mp, out_width), jnp.float32),
        grid_spec=pltpu.PrefetchScalarGridSpec(
            num_scalar_prefetch=0,
            grid=(Mp // tile_m,),
            in_specs=[pl.BlockSpec((tile_m, D), rows)] + weight_specs,
            out_specs=pl.BlockSpec((tile_m, out_width), rows),
        ),
        compiler_params=pltpu.CompilerParams(dimension_semantics=("parallel",)),
        cost_estimate=ce,
    )(x_pad, *weight_args)

    out = out[:M]

    res = {}
    col = 0
    for name, w in zip(lin_names, lin_widths):
        res[name] = out[:, col:col + w]
        col += w
    for name, w in zip(mlp_names, mlp_out_widths):
        res[name] = out[:, col:col + w]
        col += w
    return res


# Plain-JAX reference of the heads (for the correctness spot-check in __main__).
def _heads_ref(x, p):
    obj = x @ p["w_obj"] + p["b_obj"]
    verb = x @ p["w_verb"] + p["b_verb"]

    def mlp3(x, w1, b1, w2, b2, w3, b3):
        h = jax.nn.relu(x @ w1 + b1)
        h = jax.nn.relu(h @ w2 + b2)
        return jax.nn.sigmoid(h @ w3 + b3)

    sub = mlp3(x, p["ws1"], p["bs1"], p["ws2"], p["bs2"], p["ws3"], p["bs3"])
    objb = mlp3(x, p["wo1"], p["bo1"], p["wo2"], p["bo2"], p["wo3"], p["bo3"])
    return obj, verb, sub, objb


# ----------------------------------------------------------------------------
# DETRHOI model (parameters + forward)
# ----------------------------------------------------------------------------
def init_params(key, *, num_channels, hidden_dim, num_obj_classes,
                num_verb_classes, num_queries):
    ks = jax.random.split(key, 32)
    k = iter(ks)
    u = lambda shape, scale=0.1: jax.random.uniform(
        next(k), shape, jnp.float32, -scale, scale)

    p = {}
    # embeddings
    p["query_embed"] = u((num_queries, hidden_dim), 1.0)
    p["query_embed_h"] = u((num_queries, hidden_dim), 1.0)
    p["query_embed_o"] = u((num_queries, hidden_dim), 1.0)
    p["pos_guide_embed"] = u((num_queries, hidden_dim), 1.0)
    # input_proj: Conv2d(num_channels, hidden_dim, 1) — stored as (Cin, Cout)
    p["proj_w"] = u((num_channels, hidden_dim))
    p["proj_b"] = u((hidden_dim,))
    # obj / verb class linears (stored as (in, out))
    p["w_obj"] = u((hidden_dim, num_obj_classes + 1))
    p["b_obj"] = u((num_obj_classes + 1,))
    p["w_verb"] = u((hidden_dim, num_verb_classes))
    p["b_verb"] = u((num_verb_classes,))
    # sub bbox MLP(hidden, hidden, 4, 3)
    p["ws1"] = u((hidden_dim, hidden_dim)); p["bs1"] = u((hidden_dim,))
    p["ws2"] = u((hidden_dim, hidden_dim)); p["bs2"] = u((hidden_dim,))
    p["ws3"] = u((hidden_dim, 4));          p["bs3"] = u((4,))
    # obj bbox MLP(hidden, hidden, 4, 3)
    p["wo1"] = u((hidden_dim, hidden_dim)); p["bo1"] = u((hidden_dim,))
    p["wo2"] = u((hidden_dim, hidden_dim)); p["bo2"] = u((hidden_dim,))
    p["wo3"] = u((hidden_dim, 4));          p["bo3"] = u((4,))
    return p


def backbone_stub(samples, *, num_channels, hidden_dim):
    # TODO(synk): the real backbone (ResNet + positional encoding) is an
    # external module; replaced by a deterministic plain-JAX stub that emits
    # NHWC (tokens-last-channel) features directly.
    B, C, H, W = samples.shape
    pooled = samples.reshape(B, C, H // 2, 2, W // 2, 2).mean(axis=(3, 5))  # (B,C,h,w)
    reps = (num_channels + C - 1) // C
    feat = jnp.tile(pooled, (1, reps, 1, 1))[:, :num_channels]
    scale = 1.0 + jnp.arange(num_channels, dtype=jnp.float32) / num_channels
    feat = feat * scale[None, :, None, None]
    feat_nhwc = jnp.transpose(feat, (0, 2, 3, 1))                           # (B,h,w,C)
    hh, ww = H // 2, W // 2
    mask = jnp.zeros((B, hh, ww), dtype=jnp.bool_)
    pos = jnp.broadcast_to(
        jnp.sin(jnp.arange(hidden_dim, dtype=jnp.float32))[None, None, None, :] * 0.01,
        (B, hh, ww, hidden_dim))
    return feat_nhwc, mask, pos


def transformer_stub(memory_nhwc, mask, qe, qe_h, qe_o, pos_guide, pos,
                     *, num_dec_layers, aug_path):
    # TODO(synk): the real HOI transformer (encoder/decoder) is an external
    # module; replaced by a deterministic plain-JAX stub producing tensors of
    # the shapes DETRHOI's heads consume.
    B, H, W, D = memory_nhwc.shape
    mem = memory_nhwc.reshape(B, H * W, D).mean(axis=1)            # (B, D)

    def dec_stack(q_embed):
        layers = []
        for l in range(num_dec_layers):
            layers.append(jnp.tanh((mem[:, None, :] + q_embed[None, :, :])
                                   * (0.5 + 0.1 * l)))
        return jnp.stack(layers, axis=0)                           # (L, B, Q, D)

    hs = dec_stack(qe)
    h_hs = jnp.stack([dec_stack(qe_h + 0.01 * i) for i in range(aug_path)])
    o_hs = jnp.stack([dec_stack(qe_o + 0.01 * i) for i in range(aug_path)])
    inter_hs = jnp.stack([dec_stack(pos_guide + 0.01 * i) for i in range(aug_path)])
    return hs, h_hs, o_hs, inter_hs, None


def detrhoi_forward(params, samples, *, num_channels, hidden_dim,
                    num_dec_layers, aug_path, training=True):
    # backbone (NHWC features)
    src, mask, pos = backbone_stub(samples, num_channels=num_channels,
                                   hidden_dim=hidden_dim)
    # input_proj (Pallas kernel, NHWC in / NHWC out — no layout round trip)
    proj = input_proj_1x1(src, params["proj_w"], params["proj_b"])
    # transformer
    hs, h_hs, o_hs, inter_hs, _ = transformer_stub(
        proj, mask, params["query_embed"], params["query_embed_h"],
        params["query_embed_o"], params["pos_guide_embed"], pos,
        num_dec_layers=num_dec_layers, aug_path=aug_path)

    L, B, Q, D = hs.shape
    A = aug_path

    # Main path: all four heads on hs, one fused kernel call.
    res_main = run_heads(hs.reshape(-1, D), params)
    outputs_obj_class = res_main["obj"].reshape(L, B, Q, -1)
    outputs_verb_class = res_main["verb"].reshape(L, B, Q, -1)
    outputs_sub_coord = res_main["sub"].reshape(L, B, Q, 4)
    outputs_obj_coord = res_main["objbox"].reshape(L, B, Q, 4)

    # Aug paths: each token set is batched over ALL aug indices into one call
    # and computes only the heads that are actually used (no discarded work).
    res_h = run_heads(h_hs.reshape(-1, D), params,
                      do_obj=True, do_verb=False, do_sub=True, do_objbox=False)
    res_inter = run_heads(inter_hs.reshape(-1, D), params,
                          do_obj=False, do_verb=True, do_sub=False, do_objbox=False)
    res_o = run_heads(o_hs.reshape(-1, D), params,
                      do_obj=False, do_verb=False, do_sub=False, do_objbox=True)

    outputs_obj_class_aug = res_h["obj"].reshape(A, L, B, Q, -1)
    outputs_sub_coord_aug = res_h["sub"].reshape(A, L, B, Q, 4)
    outputs_verb_class_aug = res_inter["verb"].reshape(A, L, B, Q, -1)
    outputs_obj_coord_aug = res_o["objbox"].reshape(A, L, B, Q, 4)

    out = {
        "pred_obj_logits": outputs_obj_class[-1],
        "pred_verb_logits": outputs_verb_class[-1],
        "pred_sub_boxes": outputs_sub_coord[-1],
        "pred_obj_boxes": outputs_obj_coord[-1],
    }
    if training:
        out.update({
            "pred_obj_logits_aug": outputs_obj_class_aug[:, -1],
            "pred_verb_logits_aug": outputs_verb_class_aug[:, -1],
            "pred_sub_boxes_aug": outputs_sub_coord_aug[:, -1],
            "pred_obj_boxes_aug": outputs_obj_coord_aug[:, -1],
        })
    return out


if __name__ == "__main__":
    # Small, shape-consistent configuration.
    B = 2
    IMG_C, IMG_H, IMG_W = 3, 16, 16       # samples (NCHW)
    NUM_CHANNELS = 16                      # backbone.num_channels
    HIDDEN = 32                            # transformer.d_model
    NUM_QUERIES = 8
    NUM_OBJ_CLASSES = 7                    # -> obj head outputs 8 logits
    NUM_VERB_CLASSES = 8
    NUM_DEC_LAYERS = 3
    AUG_PATH = 1

    key = jax.random.PRNGKey(0)
    k_param, k_x, k_t = jax.random.split(key, 3)
    params = init_params(k_param, num_channels=NUM_CHANNELS, hidden_dim=HIDDEN,
                         num_obj_classes=NUM_OBJ_CLASSES,
                         num_verb_classes=NUM_VERB_CLASSES,
                         num_queries=NUM_QUERIES)
    samples = jax.random.normal(k_x, (B, IMG_C, IMG_H, IMG_W), jnp.float32)

    fwd = functools.partial(detrhoi_forward,
                            num_channels=NUM_CHANNELS, hidden_dim=HIDDEN,
                            num_dec_layers=NUM_DEC_LAYERS, aug_path=AUG_PATH,
                            training=True)
    out = jax.jit(lambda p, s: fwd(p, s))(params, samples)
    jax.block_until_ready(out)

    # shape sanity checks
    assert out["pred_obj_logits"].shape == (B, NUM_QUERIES, NUM_OBJ_CLASSES + 1)
    assert out["pred_verb_logits"].shape == (B, NUM_QUERIES, NUM_VERB_CLASSES)
    assert out["pred_sub_boxes"].shape == (B, NUM_QUERIES, 4)
    assert out["pred_obj_boxes"].shape == (B, NUM_QUERIES, 4)
    assert out["pred_obj_logits_aug"].shape == (AUG_PATH, B, NUM_QUERIES, NUM_OBJ_CLASSES + 1)
    assert out["pred_verb_logits_aug"].shape == (AUG_PATH, B, NUM_QUERIES, NUM_VERB_CLASSES)
    assert out["pred_sub_boxes_aug"].shape == (AUG_PATH, B, NUM_QUERIES, 4)
    assert out["pred_obj_boxes_aug"].shape == (AUG_PATH, B, NUM_QUERIES, 4)

    # numerical spot-check of the fused Pallas heads vs a plain-JAX reference
    # (M deliberately not a multiple of 8 to exercise the row padding path).
    xt = jax.random.normal(k_t, (10, HIDDEN), jnp.float32)
    got = run_heads(xt, params)
    ro, rv, rs, rb = _heads_ref(xt, params)
    assert jnp.allclose(got["obj"], ro, atol=1e-2, rtol=1e-2)
    assert jnp.allclose(got["verb"], rv, atol=1e-2, rtol=1e-2)
    assert jnp.allclose(got["sub"], rs, atol=1e-2, rtol=1e-2)
    assert jnp.allclose(got["objbox"], rb, atol=1e-2, rtol=1e-2)

    print("KERNEL_OK")
</pallas_src>

<mosaic_0001>
module attributes {stable_mosaic.version = 11 : i64} {
  func.func @_proj_kernel(%arg0: i32, %arg1: memref<64x16xf32, #tpu.memory_space<vmem>>, %arg2: memref<16x32xf32, #tpu.memory_space<vmem>>, %arg3: memref<1x32xf32, #tpu.memory_space<vmem>>, %arg4: memref<64x32xf32, #tpu.memory_space<vmem>>) attributes {dimension_semantics = [#tpu.dimension_semantics<parallel>], iteration_bounds = array<i64: 2>, scalar_prefetch = 0 : i64, scratch_operands = 0 : i64, tpu.core_type = #tpu.core_type<tc>, window_params = [{transform_indices = @transform_0, window_bounds = array<i64: 64, 16>}, {pipeline_mode = #tpu.pipeline_mode<synchronous>, transform_indices = @transform_1, window_bounds = array<i64: 16, 32>}, {pipeline_mode = #tpu.pipeline_mode<synchronous>, transform_indices = @transform_2, window_bounds = array<i64: 1, 32>}, {transform_indices = @transform_3, window_bounds = array<i64: 64, 32>}]} {
    %c0 = arith.constant 0 : index
    %c0_0 = arith.constant 0 : index
    %0 = vector.load %arg1[%c0, %c0_0] : memref<64x16xf32, #tpu.memory_space<vmem>>, vector<64x16xf32>
    %c0_1 = arith.constant 0 : index
    %c0_2 = arith.constant 0 : index
    %1 = vector.load %arg2[%c0_1, %c0_2] : memref<16x32xf32, #tpu.memory_space<vmem>>, vector<16x32xf32>
    %cst = arith.constant dense<0.000000e+00> : vector<64x32xf32>
    %2 = tpu.matmul %0, %1, %cst {dimension_numbers = #tpu.dot_dimension_numbers<[1], [0], [0], [1], [0, 0, 1, 1], [], []>} : vector<64x16xf32>, vector<16x32xf32>, vector<64x32xf32> -> vector<64x32xf32>
    %c0_3 = arith.constant 0 : index
    %c0_4 = arith.constant 0 : index
    %3 = vector.load %arg3[%c0_3, %c0_4] : memref<1x32xf32, #tpu.memory_space<vmem>>, vector<1x32xf32>
    %4 = vector.broadcast %3 : vector<1x32xf32> to vector<64x32xf32>
    %5 = arith.addf %2, %4 : vector<64x32xf32>
    %c0_5 = arith.constant 0 : index
    %c0_6 = arith.constant 0 : index
    %6 = vector.load %arg4[%c0_5, %c0_6] : memref<64x32xf32, #tpu.memory_space<vmem>>, vector<64x32xf32>
    tpu.vector_store %arg4[%c0_5, %c0_6], %5 {strides = array<i32>} : memref<64x32xf32, #tpu.memory_space<vmem>>, vector<64x32xf32>,
    return
  }
  func.func @transform_0(%arg0: i32) -> (i32, i32) {
    %c0_i32 = arith.constant 0 : i32
    %c0_i32_0 = arith.constant 0 : i32
    return %arg0, %c0_i32 : i32, i32
  }
  func.func @transform_1(%arg0: i32) -> (i32, i32) {
    %c0_i32 = arith.constant 0 : i32
    %c0_i32_0 = arith.constant 0 : i32
    %c0_i32_1 = arith.constant 0 : i32
    return %c0_i32, %c0_i32_0 : i32, i32
  }
  func.func @transform_2(%arg0: i32) -> (i32, i32) {
    %c0_i32 = arith.constant 0 : i32
    %c0_i32_0 = arith.constant 0 : i32
    %c0_i32_1 = arith.constant 0 : i32
    return %c0_i32, %c0_i32_0 : i32, i32
  }
  func.func @transform_3(%arg0: i32) -> (i32, i32) {
    %c0_i32 = arith.constant 0 : i32
    %c0_i32_0 = arith.constant 0 : i32
    return %arg0, %c0_i32 : i32, i32
  }
}

module attributes {stable_mosaic.version = 11 : i64} {
  func.func @_heads_kernel(%arg0: i32, %arg1: memref<24x32xf32, #tpu.memory_space<vmem>>, %arg2: memref<32x80xf32, #tpu.memory_space<vmem>>, %arg3: memref<1x80xf32, #tpu.memory_space<vmem>>, %arg4: memref<32x32xf32, #tpu.memory_space<vmem>>, %arg5: memref<1x32xf32, #tpu.memory_space<vmem>>, %arg6: memref<32x4xf32, #tpu.memory_space<vmem>>, %arg7: memref<1x4xf32, #tpu.memory_space<vmem>>, %arg8: memref<32x32xf32, #tpu.memory_space<vmem>>, %arg9: memref<1x32xf32, #tpu.memory_space<vmem>>, %arg10: memref<32x4xf32, #tpu.memory_space<vmem>>, %arg11: memref<1x4xf32, #tpu.memory_space<vmem>>, %arg12: memref<24x128xf32, #tpu.memory_space<vmem>>) attributes {dimension_semantics = [#tpu.dimension_semantics<parallel>], iteration_bounds = array<i64: 2>, scalar_prefetch = 0 : i64, scratch_operands = 0 : i64, tpu.core_type = #tpu.core_type<tc>, window_params = [{transform_indices = @transform_0, window_bounds = array<i64: 24, 32>}, {pipeline_mode = #tpu.pipeline_mode<synchronous>, transform_indices = @transform_1, window_bounds = array<i64: 32, 80>}, {pipeline_mode = #tpu.pipeline_mode<synchronous>, transform_indices = @transform_2, window_bounds = array<i64: 1, 80>}, {pipeline_mode = #tpu.pipeline_mode<synchronous>, transform_indices = @transform_3, window_bounds = array<i64: 32, 32>}, {pipeline_mode = #tpu.pipeline_mode<synchronous>, transform_indices = @transform_4, window_bounds = array<i64: 1, 32>}, {pipeline_mode = #tpu.pipeline_mode<synchronous>, transform_indices = @transform_5, window_bounds = array<i64: 32, 4>}, {pipeline_mode = #tpu.pipeline_mode<synchronous>, transform_indices = @transform_6, window_bounds = array<i64: 1, 4>}, {pipeline_mode = #tpu.pipeline_mode<synchronous>, transform_indices = @transform_7, window_bounds = array<i64: 32, 32>}, {pipeline_mode = #tpu.pipeline_mode<synchronous>, transform_indices = @transform_8, window_bounds = array<i64: 1, 32>}, {pipeline_mode = #tpu.pipeline_mode<synchronous>, transform_indices = @transform_9, window_bounds = array<i64: 32, 4>}, {pipeline_mode = #tpu.pipeline_mode<synchronous>, transform_indices = @transform_10, window_bounds = array<i64: 1, 4>}, {transform_indices = @transform_11, window_bounds = array<i64: 24, 128>}]} {
    %c0 = arith.constant 0 : index
    %c0_0 = arith.constant 0 : index
    %0 = vector.load %arg1[%c0, %c0_0] : memref<24x32xf32, #tpu.memory_space<vmem>>, vector<24x32xf32>
    %c0_1 = arith.constant 0 : index
    %c0_2 = arith.constant 0 : index
    %1 = vector.load %arg2[%c0_1, %c0_2] : memref<32x80xf32, #tpu.memory_space<vmem>>, vector<32x80xf32>
    %cst = arith.constant dense<0.000000e+00> : vector<24x80xf32>
    %2 = tpu.matmul %0, %1, %cst {dimension_numbers = #tpu.dot_dimension_numbers<[1], [0], [0], [1], [0, 0, 1, 1], [], []>} : vector<24x32xf32>, vector<32x80xf32>, vector<24x80xf32> -> vector<24x80xf32>
    %c0_3 = arith.constant 0 : index
    %c0_4 = arith.constant 0 : index
    %3 = vector.load %arg3[%c0_3, %c0_4] : memref<1x80xf32, #tpu.memory_space<vmem>>, vector<1x80xf32>
    %4 = vector.broadcast %3 : vector<1x80xf32> to vector<24x80xf32>
    %5 = arith.addf %2, %4 : vector<24x80xf32>
    %6 = vector.extract_strided_slice %5 {offsets = [0, 64], sizes = [24, 8], strides = [1, 1]} : vector<24x80xf32> to vector<24x8xf32>
    %7 = vector.extract_strided_slice %5 {offsets = [0, 72], sizes = [24, 8], strides = [1, 1]} : vector<24x80xf32> to vector<24x8xf32>
    %8 = vector.extract_strided_slice %5 {offsets = [0, 0], sizes = [24, 32], strides = [1, 1]} : vector<24x80xf32> to vector<24x32xf32>
    %cst_5 = arith.constant 0.000000e+00 : f32
    %9 = vector.broadcast %cst_5 : f32 to vector<24x32xf32>
    %10 = arith.maximumf %8, %9 : vector<24x32xf32>
    %c0_6 = arith.constant 0 : index
    %c0_7 = arith.constant 0 : index
    %11 = vector.load %arg4[%c0_6, %c0_7] : memref<32x32xf32, #tpu.memory_space<vmem>>, vector<32x32xf32>
    %cst_8 = arith.constant dense<0.000000e+00> : vector<24x32xf32>
    %12 = tpu.matmul %10, %11, %cst_8 {dimension_numbers = #tpu.dot_dimension_numbers<[1], [0], [0], [1], [0, 0, 1, 1], [], []>} : vector<24x32xf32>, vector<32x32xf32>, vector<24x32xf32> -> vector<24x32xf32>
    %c0_9 = arith.constant 0 : index
    %c0_10 = arith.constant 0 : index
    %13 = vector.load %arg5[%c0_9, %c0_10] : memref<1x32xf32, #tpu.memory_space<vmem>>, vector<1x32xf32>
    %14 = vector.broadcast %13 : vector<1x32xf32> to vector<24x32xf32>
    %15 = arith.addf %12, %14 : vector<24x32xf32>
    %cst_11 = arith.constant 0.000000e+00 : f32
    %16 = vector.broadcast %cst_11 : f32 to vector<24x32xf32>
    %17 = arith.maximumf %15, %16 : vector<24x32xf32>
    %c0_12 = arith.constant 0 : index
    %c0_13 = arith.constant 0 : index
    %18 = vector.load %arg6[%c0_12, %c0_13] : memref<32x4xf32, #tpu.memory_space<vmem>>, vector<32x4xf32>
    %cst_14 = arith.constant dense<0.000000e+00> : vector<24x4xf32>
    %19 = tpu.matmul %17, %18, %cst_14 {dimension_numbers = #tpu.dot_dimension_numbers<[1], [0], [0], [1], [0, 0, 1, 1], [], []>} : vector<24x32xf32>, vector<32x4xf32>, vector<24x4xf32> -> vector<24x4xf32>
    %c0_15 = arith.constant 0 : index
    %c0_16 = arith.constant 0 : index
    %20 = vector.load %arg7[%c0_15, %c0_16] : memref<1x4xf32, #tpu.memory_space<vmem>>, vector<1x4xf32>
    %21 = vector.broadcast %20 : vector<1x4xf32> to vector<24x4xf32>
    %22 = arith.addf %19, %21 : vector<24x4xf32>
    %23 = arith.negf %22 : vector<24x4xf32>
    %24 = math.exp %23 : vector<24x4xf32>
    %cst_17 = arith.constant 1.000000e+00 : f32
    %25 = vector.broadcast %cst_17 : f32 to vector<24x4xf32>
    %26 = arith.addf %25, %24 : vector<24x4xf32>
    %27 = arith.divf %25, %26 : vector<24x4xf32>
    %28 = vector.extract_strided_slice %5 {offsets = [0, 32], sizes = [24, 32], strides = [1, 1]} : vector<24x80xf32> to vector<24x32xf32>
    %cst_18 = arith.constant 0.000000e+00 : f32
    %29 = vector.broadcast %cst_18 : f32 to vector<24x32xf32>
    %30 = arith.maximumf %28, %29 : vector<24x32xf32>
    %c0_19 = arith.constant 0 : index
    %c0_20 = arith.constant 0 : index
    %31 = vector.load %arg8[%c0_19, %c0_20] : memref<32x32xf32, #tpu.memory_space<vmem>>, vector<32x32xf32>
    %cst_21 = arith.constant dense<0.000000e+00> : vector<24x32xf32>
    %32 = tpu.matmul %30, %31, %cst_21 {dimension_numbers = #tpu.dot_dimension_numbers<[1], [0], [0], [1], [0, 0, 1, 1], [], []>} : vector<24x32xf32>, vector<32x32xf32>, vector<24x32xf32> -> vector<24x32xf32>
    %c0_22 = arith.constant 0 : index
    %c0_23 = arith.constant 0 : index
    %33 = vector.load %arg9[%c0_22, %c0_23] : memref<1x32xf32, #tpu.memory_space<vmem>>, vector<1x32xf32>
    %34 = vector.broadcast %33 : vector<1x32xf32> to vector<24x32xf32>
    %35 = arith.addf %32, %34 : vector<24x32xf32>
    %cst_24 = arith.constant 0.000000e+00 : f32
    %36 = vector.broadcast %cst_24 : f32 to vector<24x32xf32>
    %37 = arith.maximumf %35, %36 : vector<24x32xf32>
    %c0_25 = arith.constant 0 : index
    %c0_26 = arith.constant 0 : index
    %38 = vector.load %arg10[%c0_25, %c0_26] : memref<32x4xf32, #tpu.memory_space<vmem>>, vector<32x4xf32>
    %cst_27 = arith.constant dense<0.000000e+00> : vector<24x4xf32>
    %39 = tpu.matmul %37, %38, %cst_27 {dimension_numbers = #tpu.dot_dimension_numbers<[1], [0], [0], [1], [0, 0, 1, 1], [], []>} : vector<24x32xf32>, vector<32x4xf32>, vector<24x4xf32> -> vector<24x4xf32>
    %c0_28 = arith.constant 0 : index
    %c0_29 = arith.constant 0 : index
    %40 = vector.load %arg11[%c0_28, %c0_29] : memref<1x4xf32, #tpu.memory_space<vmem>>, vector<1x4xf32>
    %41 = vector.broadcast %40 : vector<1x4xf32> to vector<24x4xf32>
    %42 = arith.addf %39, %41 : vector<24x4xf32>
    %43 = arith.negf %42 : vector<24x4xf32>
    %44 = math.exp %43 : vector<24x4xf32>
    %cst_30 = arith.constant 1.000000e+00 : f32
    %45 = vector.broadcast %cst_30 : f32 to vector<24x4xf32>
    %46 = arith.addf %45, %44 : vector<24x4xf32>
    %47 = arith.divf %45, %46 : vector<24x4xf32>
    %cst_31 = arith.constant 0.000000e+00 : f32
    %48 = vector.broadcast %cst_31 : f32 to vector<24x104xf32>
    %49 = tpu.concatenate %6, %7, %27, %47, %48 in 1 : vector<24x8xf32>, vector<24x8xf32>, vector<24x4xf32>, vector<24x4xf32>, vector<24x104xf32> -> vector<24x128xf32>
    %c0_32 = arith.constant 0 : index
    %c0_33 = arith.constant 0 : index
    %50 = vector.load %arg12[%c0_32, %c0_33] : memref<24x128xf32, #tpu.memory_space<vmem>>, vector<24x128xf32>
    tpu.vector_store %arg12[%c0_32, %c0_33], %49 {strides = array<i32>} : memref<24x128xf32, #tpu.memory_space<vmem>>, vector<24x128xf32>,
    return
  }
  func.func @transform_0(%arg0: i32) -> (i32, i32) {
    %c0_i32 = arith.constant 0 : i32
    %c0_i32_0 = arith.constant 0 : i32
    return %arg0, %c0_i32 : i32, i32
  }
  func.func @transform_1(%arg0: i32) -> (i32, i32) {
    %c0_i32 = arith.constant 0 : i32
    %c0_i32_0 = arith.constant 0 : i32
    %c0_i32_1 = arith.constant 0 : i32
    return %c0_i32, %c0_i32_0 : i32, i32
  }
  func.func @transform_2(%arg0: i32) -> (i32, i32) {
    %c0_i32 = arith.constant 0 : i32
    %c0_i32_0 = arith.constant 0 : i32
    %c0_i32_1 = arith.constant 0 : i32
    return %c0_i32, %c0_i32_0 : i32, i32
  }
  func.func @transform_3(%arg0: i32) -> (i32, i32) {
    %c0_i32 = arith.constant 0 : i32
    %c0_i32_0 = arith.constant 0 : i32
    %c0_i32_1 = arith.constant 0 : i32
    return %c0_i32, %c0_i32_0 : i32, i32
  }
  func.func @transform_4(%arg0: i32) -> (i32, i32) {
    %c0_i32 = arith.constant 0 : i32
    %c0_i32_0 = arith.constant 0 : i32
    %c0_i32_1 = arith.constant 0 : i32
    return %c0_i32, %c0_i32_0 : i32, i32
  }
  func.func @transform_5(%arg0: i32) -> (i32, i32) {
    %c0_i32 = arith.constant 0 : i32
    %c0_i32_0 = arith.constant 0 : i32
    %c0_i32_1 = arith.constant 0 : i32
    return %c0_i32, %c0_i32_0 : i32, i32
  }
  func.func @transform_6(%arg0: i32) -> (i32, i32) {
    %c0_i32 = arith.constant 0 : i32
    %c0_i32_0 = arith.constant 0 : i32
    %c0_i32_1 = arith.constant 0 : i32
    return %c0_i32, %c0_i32_0 : i32, i32
  }
  func.func @transform_7(%arg0: i32) -> (i32, i32) {
    %c0_i32 = arith.constant 0 : i32
    %c0_i32_0 = arith.constant 0 : i32
    %c0_i32_1 = arith.constant 0 : i32
    return %c0_i32, %c0_i32_0 : i32, i32
  }
  func.func @transform_8(%arg0: i32) -> (i32, i32) {
    %c0_i32 = arith.constant 0 : i32
    %c0_i32_0 = arith.constant 0 : i32
    %c0_i32_1 = arith.constant 0 : i32
    return %c0_i32, %c0_i32_0 : i32, i32
  }
  func.func @transform_9(%arg0: i32) -> (i32, i32) {
    %c0_i32 = arith.constant 0 : i32
    %c0_i32_0 = arith.constant 0 : i32
    %c0_i32_1 = arith.constant 0 : i32
    return %c0_i32, %c0_i32_0 : i32, i32
  }
  func.func @transform_10(%arg0: i32) -> (i32, i32) {
    %c0_i32 = arith.constant 0 : i32
    %c0_i32_0 = arith.constant 0 : i32
    %c0_i32_1 = arith.constant 0 : i32
    return %c0_i32, %c0_i32_0 : i32, i32
  }
  func.func @transform_11(%arg0: i32) -> (i32, i32) {
    %c0_i32 = arith.constant 0 : i32
    %c0_i32_0 = arith.constant 0 : i32
    return %arg0, %c0_i32 : i32, i32
  }
}

module attributes {stable_mosaic.version = 11 : i64} {
  func.func @_heads_kernel(%arg0: i32, %arg1: memref<24x32xf32, #tpu.memory_space<vmem>>, %arg2: memref<32x40xf32, #tpu.memory_space<vmem>>, %arg3: memref<1x40xf32, #tpu.memory_space<vmem>>, %arg4: memref<32x32xf32, #tpu.memory_space<vmem>>, %arg5: memref<1x32xf32, #tpu.memory_space<vmem>>, %arg6: memref<32x4xf32, #tpu.memory_space<vmem>>, %arg7: memref<1x4xf32, #tpu.memory_space<vmem>>, %arg8: memref<24x128xf32, #tpu.memory_space<vmem>>) attributes {dimension_semantics = [#tpu.dimension_semantics<parallel>], iteration_bounds = array<i64: 2>, scalar_prefetch = 0 : i64, scratch_operands = 0 : i64, tpu.core_type = #tpu.core_type<tc>, window_params = [{transform_indices = @transform_0, window_bounds = array<i64: 24, 32>}, {pipeline_mode = #tpu.pipeline_mode<synchronous>, transform_indices = @transform_1, window_bounds = array<i64: 32, 40>}, {pipeline_mode = #tpu.pipeline_mode<synchronous>, transform_indices = @transform_2, window_bounds = array<i64: 1, 40>}, {pipeline_mode = #tpu.pipeline_mode<synchronous>, transform_indices = @transform_3, window_bounds = array<i64: 32, 32>}, {pipeline_mode = #tpu.pipeline_mode<synchronous>, transform_indices = @transform_4, window_bounds = array<i64: 1, 32>}, {pipeline_mode = #tpu.pipeline_mode<synchronous>, transform_indices = @transform_5, window_bounds = array<i64: 32, 4>}, {pipeline_mode = #tpu.pipeline_mode<synchronous>, transform_indices = @transform_6, window_bounds = array<i64: 1, 4>}, {transform_indices = @transform_7, window_bounds = array<i64: 24, 128>}]} {
    %c0 = arith.constant 0 : index
    %c0_0 = arith.constant 0 : index
    %0 = vector.load %arg1[%c0, %c0_0] : memref<24x32xf32, #tpu.memory_space<vmem>>, vector<24x32xf32>
    %c0_1 = arith.constant 0 : index
    %c0_2 = arith.constant 0 : index
    %1 = vector.load %arg2[%c0_1, %c0_2] : memref<32x40xf32, #tpu.memory_space<vmem>>, vector<32x40xf32>
    %cst = arith.constant dense<0.000000e+00> : vector<24x40xf32>
    %2 = tpu.matmul %0, %1, %cst {dimension_numbers = #tpu.dot_dimension_numbers<[1], [0], [0], [1], [0, 0, 1, 1], [], []>} : vector<24x32xf32>, vector<32x40xf32>, vector<24x40xf32> -> vector<24x40xf32>
    %c0_3 = arith.constant 0 : index
    %c0_4 = arith.constant 0 : index
    %3 = vector.load %arg3[%c0_3, %c0_4] : memref<1x40xf32, #tpu.memory_space<vmem>>, vector<1x40xf32>
    %4 = vector.broadcast %3 : vector<1x40xf32> to vector<24x40xf32>
    %5 = arith.addf %2, %4 : vector<24x40xf32>
    %6 = vector.extract_strided_slice %5 {offsets = [0, 32], sizes = [24, 8], strides = [1, 1]} : vector<24x40xf32> to vector<24x8xf32>
    %7 = vector.extract_strided_slice %5 {offsets = [0, 0], sizes = [24, 32], strides = [1, 1]} : vector<24x40xf32> to vector<24x32xf32>
    %cst_5 = arith.constant 0.000000e+00 : f32
    %8 = vector.broadcast %cst_5 : f32 to vector<24x32xf32>
    %9 = arith.maximumf %7, %8 : vector<24x32xf32>
    %c0_6 = arith.constant 0 : index
    %c0_7 = arith.constant 0 : index
    %10 = vector.load %arg4[%c0_6, %c0_7] : memref<32x32xf32, #tpu.memory_space<vmem>>, vector<32x32xf32>
    %cst_8 = arith.constant dense<0.000000e+00> : vector<24x32xf32>
    %11 = tpu.matmul %9, %10, %cst_8 {dimension_numbers = #tpu.dot_dimension_numbers<[1], [0], [0], [1], [0, 0, 1, 1], [], []>} : vector<24x32xf32>, vector<32x32xf32>, vector<24x32xf32> -> vector<24x32xf32>
    %c0_9 = arith.constant 0 : index
    %c0_10 = arith.constant 0 : index
    %12 = vector.load %arg5[%c0_9, %c0_10] : memref<1x32xf32, #tpu.memory_space<vmem>>, vector<1x32xf32>
    %13 = vector.broadcast %12 : vector<1x32xf32> to vector<24x32xf32>
    %14 = arith.addf %11, %13 : vector<24x32xf32>
    %cst_11 = arith.constant 0.000000e+00 : f32
    %15 = vector.broadcast %cst_11 : f32 to vector<24x32xf32>
    %16 = arith.maximumf %14, %15 : vector<24x32xf32>
    %c0_12 = arith.constant 0 : index
    %c0_13 = arith.constant 0 : index
    %17 = vector.load %arg6[%c0_12, %c0_13] : memref<32x4xf32, #tpu.memory_space<vmem>>, vector<32x4xf32>
    %cst_14 = arith.constant dense<0.000000e+00> : vector<24x4xf32>
    %18 = tpu.matmul %16, %17, %cst_14 {dimension_numbers = #tpu.dot_dimension_numbers<[1], [0], [0], [1], [0, 0, 1, 1], [], []>} : vector<24x32xf32>, vector<32x4xf32>, vector<24x4xf32> -> vector<24x4xf32>
    %c0_15 = arith.constant 0 : index
    %c0_16 = arith.constant 0 : index
    %19 = vector.load %arg7[%c0_15, %c0_16] : memref<1x4xf32, #tpu.memory_space<vmem>>, vector<1x4xf32>
    %20 = vector.broadcast %19 : vector<1x4xf32> to vector<24x4xf32>
    %21 = arith.addf %18, %20 : vector<24x4xf32>
    %22 = arith.negf %21 : vector<24x4xf32>
    %23 = math.exp %22 : vector<24x4xf32>
    %cst_17 = arith.constant 1.000000e+00 : f32
    %24 = vector.broadcast %cst_17 : f32 to vector<24x4xf32>
    %25 = arith.addf %24, %23 : vector<24x4xf32>
    %26 = arith.divf %24, %25 : vector<24x4xf32>
    %cst_18 = arith.constant 0.000000e+00 : f32
    %27 = vector.broadcast %cst_18 : f32 to vector<24x116xf32>
    %28 = tpu.concatenate %6, %26, %27 in 1 : vector<24x8xf32>, vector<24x4xf32>, vector<24x116xf32> -> vector<24x128xf32>
    %c0_19 = arith.constant 0 : index
    %c0_20 = arith.constant 0 : index
    %29 = vector.load %arg8[%c0_19, %c0_20] : memref<24x128xf32, #tpu.memory_space<vmem>>, vector<24x128xf32>
    tpu.vector_store %arg8[%c0_19, %c0_20], %28 {strides = array<i32>} : memref<24x128xf32, #tpu.memory_space<vmem>>, vector<24x128xf32>,
    return
  }
  func.func @transform_0(%arg0: i32) -> (i32, i32) {
    %c0_i32 = arith.constant 0 : i32
    %c0_i32_0 = arith.constant 0 : i32
    return %arg0, %c0_i32 : i32, i32
  }
  func.func @transform_1(%arg0: i32) -> (i32, i32) {
    %c0_i32 = arith.constant 0 : i32
    %c0_i32_0 = arith.constant 0 : i32
    %c0_i32_1 = arith.constant 0 : i32
    return %c0_i32, %c0_i32_0 : i32, i32
  }
  func.func @transform_2(%arg0: i32) -> (i32, i32) {
    %c0_i32 = arith.constant 0 : i32
    %c0_i32_0 = arith.constant 0 : i32
    %c0_i32_1 = arith.constant 0 : i32
    return %c0_i32, %c0_i32_0 : i32, i32
  }
  func.func @transform_3(%arg0: i32) -> (i32, i32) {
    %c0_i32 = arith.constant 0 : i32
    %c0_i32_0 = arith.constant 0 : i32
    %c0_i32_1 = arith.constant 0 : i32
    return %c0_i32, %c0_i32_0 : i32, i32
  }
  func.func @transform_4(%arg0: i32) -> (i32, i32) {
    %c0_i32 = arith.constant 0 : i32
    %c0_i32_0 = arith.constant 0 : i32
    %c0_i32_1 = arith.constant 0 : i32
    return %c0_i32, %c0_i32_0 : i32, i32
  }
  func.func @transform_5(%arg0: i32) -> (i32, i32) {
    %c0_i32 = arith.constant 0 : i32
    %c0_i32_0 = arith.constant 0 : i32
    %c0_i32_1 = arith.constant 0 : i32
    return %c0_i32, %c0_i32_0 : i32, i32
  }
  func.func @transform_6(%arg0: i32) -> (i32, i32) {
    %c0_i32 = arith.constant 0 : i32
    %c0_i32_0 = arith.constant 0 : i32
    %c0_i32_1 = arith.constant 0 : i32
    return %c0_i32, %c0_i32_0 : i32, i32
  }
  func.func @transform_7(%arg0: i32) -> (i32, i32) {
    %c0_i32 = arith.constant 0 : i32
    %c0_i32_0 = arith.constant 0 : i32
    return %arg0, %c0_i32 : i32, i32
  }
}

module attributes {stable_mosaic.version = 11 : i64} {
  func.func @_heads_kernel(%arg0: i32, %arg1: memref<24x32xf32, #tpu.memory_space<vmem>>, %arg2: memref<32x32xf32, #tpu.memory_space<vmem>>, %arg3: memref<1x32xf32, #tpu.memory_space<vmem>>, %arg4: memref<32x32xf32, #tpu.memory_space<vmem>>, %arg5: memref<1x32xf32, #tpu.memory_space<vmem>>, %arg6: memref<32x4xf32, #tpu.memory_space<vmem>>, %arg7: memref<1x4xf32, #tpu.memory_space<vmem>>, %arg8: memref<24x128xf32, #tpu.memory_space<vmem>>) attributes {dimension_semantics = [#tpu.dimension_semantics<parallel>], iteration_bounds = array<i64: 2>, scalar_prefetch = 0 : i64, scratch_operands = 0 : i64, tpu.core_type = #tpu.core_type<tc>, window_params = [{transform_indices = @transform_0, window_bounds = array<i64: 24, 32>}, {pipeline_mode = #tpu.pipeline_mode<synchronous>, transform_indices = @transform_1, window_bounds = array<i64: 32, 32>}, {pipeline_mode = #tpu.pipeline_mode<synchronous>, transform_indices = @transform_2, window_bounds = array<i64: 1, 32>}, {pipeline_mode = #tpu.pipeline_mode<synchronous>, transform_indices = @transform_3, window_bounds = array<i64: 32, 32>}, {pipeline_mode = #tpu.pipeline_mode<synchronous>, transform_indices = @transform_4, window_bounds = array<i64: 1, 32>}, {pipeline_mode = #tpu.pipeline_mode<synchronous>, transform_indices = @transform_5, window_bounds = array<i64: 32, 4>}, {pipeline_mode = #tpu.pipeline_mode<synchronous>, transform_indices = @transform_6, window_bounds = array<i64: 1, 4>}, {transform_indices = @transform_7, window_bounds = array<i64: 24, 128>}]} {
    %c0 = arith.constant 0 : index
    %c0_0 = arith.constant 0 : index
    %0 = vector.load %arg1[%c0, %c0_0] : memref<24x32xf32, #tpu.memory_space<vmem>>, vector<24x32xf32>
    %c0_1 = arith.constant 0 : index
    %c0_2 = arith.constant 0 : index
    %1 = vector.load %arg2[%c0_1, %c0_2] : memref<32x32xf32, #tpu.memory_space<vmem>>, vector<32x32xf32>
    %cst = arith.constant dense<0.000000e+00> : vector<24x32xf32>
    %2 = tpu.matmul %0, %1, %cst {dimension_numbers = #tpu.dot_dimension_numbers<[1], [0], [0], [1], [0, 0, 1, 1], [], []>} : vector<24x32xf32>, vector<32x32xf32>, vector<24x32xf32> -> vector<24x32xf32>
    %c0_3 = arith.constant 0 : index
    %c0_4 = arith.constant 0 : index
    %3 = vector.load %arg3[%c0_3, %c0_4] : memref<1x32xf32, #tpu.memory_space<vmem>>, vector<1x32xf32>
    %4 = vector.broadcast %3 : vector<1x32xf32> to vector<24x32xf32>
    %5 = arith.addf %2, %4 : vector<24x32xf32>
    %cst_5 = arith.constant 0.000000e+00 : f32
    %6 = vector.broadcast %cst_5 : f32 to vector<24x32xf32>
    %7 = arith.maximumf %5, %6 : vector<24x32xf32>
    %c0_6 = arith.constant 0 : index
    %c0_7 = arith.constant 0 : index
    %8 = vector.load %arg4[%c0_6, %c0_7] : memref<32x32xf32, #tpu.memory_space<vmem>>, vector<32x32xf32>
    %cst_8 = arith.constant dense<0.000000e+00> : vector<24x32xf32>
    %9 = tpu.matmul %7, %8, %cst_8 {dimension_numbers = #tpu.dot_dimension_numbers<[1], [0], [0], [1], [0, 0, 1, 1], [], []>} : vector<24x32xf32>, vector<32x32xf32>, vector<24x32xf32> -> vector<24x32xf32>
    %c0_9 = arith.constant 0 : index
    %c0_10 = arith.constant 0 : index
    %10 = vector.load %arg5[%c0_9, %c0_10] : memref<1x32xf32, #tpu.memory_space<vmem>>, vector<1x32xf32>
    %11 = vector.broadcast %10 : vector<1x32xf32> to vector<24x32xf32>
    %12 = arith.addf %9, %11 : vector<24x32xf32>
    %cst_11 = arith.constant 0.000000e+00 : f32
    %13 = vector.broadcast %cst_11 : f32 to vector<24x32xf32>
    %14 = arith.maximumf %12, %13 : vector<24x32xf32>
    %c0_12 = arith.constant 0 : index
    %c0_13 = arith.constant 0 : index
    %15 = vector.load %arg6[%c0_12, %c0_13] : memref<32x4xf32, #tpu.memory_space<vmem>>, vector<32x4xf32>
    %cst_14 = arith.constant dense<0.000000e+00> : vector<24x4xf32>
    %16 = tpu.matmul %14, %15, %cst_14 {dimension_numbers = #tpu.dot_dimension_numbers<[1], [0], [0], [1], [0, 0, 1, 1], [], []>} : vector<24x32xf32>, vector<32x4xf32>, vector<24x4xf32> -> vector<24x4xf32>
    %c0_15 = arith.constant 0 : index
    %c0_16 = arith.constant 0 : index
    %17 = vector.load %arg7[%c0_15, %c0_16] : memref<1x4xf32, #tpu.memory_space<vmem>>, vector<1x4xf32>
    %18 = vector.broadcast %17 : vector<1x4xf32> to vector<24x4xf32>
    %19 = arith.addf %16, %18 : vector<24x4xf32>
    %20 = arith.negf %19 : vector<24x4xf32>
    %21 = math.exp %20 : vector<24x4xf32>
    %cst_17 = arith.constant 1.000000e+00 : f32
    %22 = vector.broadcast %cst_17 : f32 to vector<24x4xf32>
    %23 = arith.addf %22, %21 : vector<24x4xf32>
    %24 = arith.divf %22, %23 : vector<24x4xf32>
    %cst_18 = arith.constant 0.000000e+00 : f32
    %25 = vector.broadcast %cst_18 : f32 to vector<24x124xf32>
    %26 = tpu.concatenate %24, %25 in 1 : vector<24x4xf32>, vector<24x124xf32> -> vector<24x128xf32>
    %c0_19 = arith.constant 0 : index
    %c0_20 = arith.constant 0 : index
    %27 = vector.load %arg8[%c0_19, %c0_20] : memref<24x128xf32, #tpu.memory_space<vmem>>, vector<24x128xf32>
    tpu.vector_store %arg8[%c0_19, %c0_20], %26 {strides = array<i32>} : memref<24x128xf32, #tpu.memory_space<vmem>>, vector<24x128xf32>,
    return
  }
  func.func @transform_0(%arg0: i32) -> (i32, i32) {
    %c0_i32 = arith.constant 0 : i32
    %c0_i32_0 = arith.constant 0 : i32
    return %arg0, %c0_i32 : i32, i32
  }
  func.func @transform_1(%arg0: i32) -> (i32, i32) {
    %c0_i32 = arith.constant 0 : i32
    %c0_i32_0 = arith.constant 0 : i32
    %c0_i32_1 = arith.constant 0 : i32
    return %c0_i32, %c0_i32_0 : i32, i32
  }
  func.func @transform_2(%arg0: i32) -> (i32, i32) {
    %c0_i32 = arith.constant 0 : i32
    %c0_i32_0 = arith.constant 0 : i32
    %c0_i32_1 = arith.constant 0 : i32
    return %c0_i32, %c0_i32_0 : i32, i32
  }
  func.func @transform_3(%arg0: i32) -> (i32, i32) {
    %c0_i32 = arith.constant 0 : i32
    %c0_i32_0 = arith.constant 0 : i32
    %c0_i32_1 = arith.constant 0 : i32
    return %c0_i32, %c0_i32_0 : i32, i32
  }
  func.func @transform_4(%arg0: i32) -> (i32, i32) {
    %c0_i32 = arith.constant 0 : i32
    %c0_i32_0 = arith.constant 0 : i32
    %c0_i32_1 = arith.constant 0 : i32
    return %c0_i32, %c0_i32_0 : i32, i32
  }
  func.func @transform_5(%arg0: i32) -> (i32, i32) {
    %c0_i32 = arith.constant 0 : i32
    %c0_i32_0 = arith.constant 0 : i32
    %c0_i32_1 = arith.constant 0 : i32
    return %c0_i32, %c0_i32_0 : i32, i32
  }
  func.func @transform_6(%arg0: i32) -> (i32, i32) {
    %c0_i32 = arith.constant 0 : i32
    %c0_i32_0 = arith.constant 0 : i32
    %c0_i32_1 = arith.constant 0 : i32
    return %c0_i32, %c0_i32_0 : i32, i32
  }
  func.func @transform_7(%arg0: i32) -> (i32, i32) {
    %c0_i32 = arith.constant 0 : i32
    %c0_i32_0 = arith.constant 0 : i32
    return %arg0, %c0_i32 : i32, i32
  }
}

module attributes {stable_mosaic.version = 11 : i64} {
  func.func @_heads_kernel(%arg0: i32, %arg1: memref<24x32xf32, #tpu.memory_space<vmem>>, %arg2: memref<32x8xf32, #tpu.memory_space<vmem>>, %arg3: memref<1x8xf32, #tpu.memory_space<vmem>>, %arg4: memref<24x128xf32, #tpu.memory_space<vmem>>) attributes {dimension_semantics = [#tpu.dimension_semantics<parallel>], iteration_bounds = array<i64: 2>, scalar_prefetch = 0 : i64, scratch_operands = 0 : i64, tpu.core_type = #tpu.core_type<tc>, window_params = [{transform_indices = @transform_0, window_bounds = array<i64: 24, 32>}, {pipeline_mode = #tpu.pipeline_mode<synchronous>, transform_indices = @transform_1, window_bounds = array<i64: 32, 8>}, {pipeline_mode = #tpu.pipeline_mode<synchronous>, transform_indices = @transform_2, window_bounds = array<i64: 1, 8>}, {transform_indices = @transform_3, window_bounds = array<i64: 24, 128>}]} {
    %c0 = arith.constant 0 : index
    %c0_0 = arith.constant 0 : index
    %0 = vector.load %arg1[%c0, %c0_0] : memref<24x32xf32, #tpu.memory_space<vmem>>, vector<24x32xf32>
    %c0_1 = arith.constant 0 : index
    %c0_2 = arith.constant 0 : index
    %1 = vector.load %arg2[%c0_1, %c0_2] : memref<32x8xf32, #tpu.memory_space<vmem>>, vector<32x8xf32>
    %cst = arith.constant dense<0.000000e+00> : vector<24x8xf32>
    %2 = tpu.matmul %0, %1, %cst {dimension_numbers = #tpu.dot_dimension_numbers<[1], [0], [0], [1], [0, 0, 1, 1], [], []>} : vector<24x32xf32>, vector<32x8xf32>, vector<24x8xf32> -> vector<24x8xf32>
    %c0_3 = arith.constant 0 : index
    %c0_4 = arith.constant 0 : index
    %3 = vector.load %arg3[%c0_3, %c0_4] : memref<1x8xf32, #tpu.memory_space<vmem>>, vector<1x8xf32>
    %4 = vector.broadcast %3 : vector<1x8xf32> to vector<24x8xf32>
    %5 = arith.addf %2, %4 : vector<24x8xf32>
    %cst_5 = arith.constant 0.000000e+00 : f32
    %6 = vector.broadcast %cst_5 : f32 to vector<24x120xf32>
    %7 = tpu.concatenate %5, %6 in 1 : vector<24x8xf32>, vector<24x120xf32> -> vector<24x128xf32>
    %c0_6 = arith.constant 0 : index
    %c0_7 = arith.constant 0 : index
    %8 = vector.load %arg4[%c0_6, %c0_7] : memref<24x128xf32, #tpu.memory_space<vmem>>, vector<24x128xf32>
    tpu.vector_store %arg4[%c0_6, %c0_7], %7 {strides = array<i32>} : memref<24x128xf32, #tpu.memory_space<vmem>>, vector<24x128xf32>,
    return
  }
  func.func @transform_0(%arg0: i32) -> (i32, i32) {
    %c0_i32 = arith.constant 0 : i32
    %c0_i32_0 = arith.constant 0 : i32
    return %arg0, %c0_i32 : i32, i32
  }
  func.func @transform_1(%arg0: i32) -> (i32, i32) {
    %c0_i32 = arith.constant 0 : i32
    %c0_i32_0 = arith.constant 0 : i32
    %c0_i32_1 = arith.constant 0 : i32
    return %c0_i32, %c0_i32_0 : i32, i32
  }
  func.func @transform_2(%arg0: i32) -> (i32, i32) {
    %c0_i32 = arith.constant 0 : i32
    %c0_i32_0 = arith.constant 0 : i32
    %c0_i32_1 = arith.constant 0 : i32
    return %c0_i32, %c0_i32_0 : i32, i32
  }
  func.func @transform_3(%arg0: i32) -> (i32, i32) {
    %c0_i32 = arith.constant 0 : i32
    %c0_i32_0 = arith.constant 0 : i32
    return %arg0, %c0_i32 : i32, i32
  }
}

</mosaic_0001>

<bundles_post_ra>
// kernel: _lambda_.5
= control target key start
LH: loop header
LB: loop body
LE: loop exit
PB: predicated region body
PF: predicated region fallthrough
CT: control target
= control target key end

     0   :  { %s381_s12 = smov 0   ;;  %s423_s0 = inlined_call_operand.vmem [shape: f32[128,16], index: 0, kind: input, shape index: {}]   ;;  %s424_s1 = inlined_call_operand.vmem [shape: f32[16,32], index: 1, kind: input, shape index: {}]   ;;  %s425_s2 = inlined_call_operand.vmem [shape: f32[1,32], index: 2, kind: input, shape index: {}]   ;;  %s426_s3 = inlined_call_operand.vmem [shape: f32[128,32], index: 3, kind: output, shape index: {}]  }
   0x1 LB: > { %s319_s13 = sadd.s32 4294967295, %s359_s12   ;;  %p323_p0 = scmp.ge.s32.totalorder %s359_s12, 1  ;;  %s359_s12 = sphi %s381_s12, %s13_s12  }
   0x2   : > { %p138_p1 = scmp.lt.s32.totalorder %s359_s12, 3 }
   0x4   : > { %p139_p2 = pnand %p323_p0, %p138_p1 }
   0x5   : > { %s324_s18 = sshll.u32 (!%p139_p2), %s319_s13, 3 }
   0x6   : > { %142 = sbr.rel (%p139_p2) target bundleno = 160 (0xa0), region = 32  ;;  %p163_p3 = scmp.lt.s32.totalorder (!%p139_p2), %s324_s18, 15 }
   0xb   : > { %v183_v0 = vld [vmem:[%s424_s1 + $0x8] sm:$0xff]  ;;  %v182_v1 = vld [vmem:[%s424_s1] sm:$0xff]  ;;  %s428_s18 = smov (!%p163_p3, %s324_s18), 15  ;;  %vm188_vm0 = vcmask 130048   ;;  %vm254_vm1 = vcmask 261120  }
   0xc   : > { %339 = vmatpush.msra.mxu2 %v183_v0  ;;  %340 = vmatpush.msra.mxu3 %v183_v0  ;;  %s325_s19 = sshll.u32 %s428_s18, 3  ;;  %v352_v10 = vld [vmem:[%s425_s2] ss:$0 sm:$0xff] }
   0xd   : > { %227 = vmatpush.msra.mxu0 %v183_v0  ;;  %338 = vmatpush.msra.mxu1 %v183_v0  ;;  %s166_s22 = scalar_lea.vmem %s423_s0, %s325_s19  ;;  %s172_s27 = scalar_lea.vmem %s426_s3, %s325_s19 }
   0xe   : > { %342 = vmatpush.msra.mxu2 %v182_v1  ;;  %343 = vmatpush.msra.mxu3 %v182_v1  ;;  %v178_v2 = vld [vmem:[%s166_s22 + $0x20] sm:$0xff]  ;;  %v180_v3 = vld [vmem:[%s166_s22 + $0x30] sm:$0xff]  ;;  %v179_v6 = vld [vmem:[%s166_s22 + $0x28] sm:$0xff] }
   0xf   : > { %228 = vmatpush.msra.mxu0 %v182_v1  ;;  %341 = vmatpush.msra.mxu1 %v182_v1  ;;  %v174_v4 = vld [vmem:[%s166_s22] sm:$0xff]  ;;  %v176_v5 = vld [vmem:[%s166_s22 + $0x10] sm:$0xff]  ;;  %v181_v7 = vld [vmem:[%s166_s22 + $0x38] sm:$0xff] }
  0x10   : > { %332 = vmatmul.msk.f32.vlgmr.msra.gmra.mxu2 %vm188_vm0, %v178_v2  ;;  %334 = vmatmul.msk.f32.vlgmr.msra.gmra.mxu3 %vm188_vm0, %v180_v3  ;;  %v175_v8 = vld [vmem:[%s166_s22 + $0x8] sm:$0xff]  ;;  %v177_v9 = vld [vmem:[%s166_s22 + $0x18] sm:$0xff] }
  0x11   : > { %328 = vmatmul.msk.f32.vlgmr.msra.gmra.mxu0 %vm188_vm0, %v174_v4  ;;  %330 = vmatmul.msk.f32.vlgmr.msra.gmra.mxu1 %vm188_vm0, %v176_v5 }
  0x18   : > { %333 = vmatmul.msk.f32.gmra.mxu2 %vm188_vm0, %v179_v6  ;;  %335 = vmatmul.msk.f32.gmra.mxu3 %vm188_vm0, %v181_v7 }
  0x19   : > { %329 = vmatmul.msk.f32.gmra.mxu0 %vm188_vm0, %v175_v8  ;;  %331 = vmatmul.msk.f32.gmra.mxu1 %vm188_vm0, %v177_v9 }
  0x8e   : > { %v230_v11 = vpop.f32.mrf.mxu0  ;;  %v236_v12 = vpop.f32.mrf.mxu1 }
  0x8f   : > { %v231_v13 = vadd.f32 %v352_v10, %v230_v11  ;;  %v237_v14 = vadd.f32 %v352_v10, %v236_v12 }
  0x91   : > { %255 = vst.msk [vmem:[%s172_s27] sm:$0xff] %vm254_vm1, %v231_v13 }
  0x92   : > { %257 = vst.msk [vmem:[%s172_s27 + $0x10] sm:$0xff] %vm254_vm1, %v237_v14 }
  0x93   : > { %v242_v15 = vpop.f32.mrf.mxu2  ;;  %v248_v16 = vpop.f32.mrf.mxu3 }
  0x94   : > { %v243_v17 = vadd.f32 %v352_v10, %v242_v15  ;;  %v249_v18 = vadd.f32 %v352_v10, %v248_v16 }
  0x96   : > { %259 = vst.msk [vmem:[%s172_s27 + $0x20] sm:$0xff] %vm254_vm1, %v243_v17  ;;  %v233_v19 = vpop.f32.mrf.mxu0  ;;  %v239_v20 = vpop.f32.mrf.mxu1 }
  0x97   : > { %261 = vst.msk [vmem:[%s172_s27 + $0x30] sm:$0xff] %vm254_vm1, %v249_v18  ;;  %v234_v21 = vadd.f32 %v352_v10, %v233_v19  ;;  %v240_v22 = vadd.f32 %v352_v10, %v239_v20 }
  0x99   : > { %256 = vst.msk [vmem:[%s172_s27 + $0x8] sm:$0xff] %vm254_vm1, %v234_v21 }
  0x9a   : > { %258 = vst.msk [vmem:[%s172_s27 + $0x18] sm:$0xff] %vm254_vm1, %v240_v22 }
  0x9b   : > { %v245_v23 = vpop.f32.mrf.mxu2  ;;  %v251_v24 = vpop.f32.mrf.mxu3 }
  0x9c   : > { %v246_v25 = vadd.f32 %v352_v10, %v245_v23  ;;  %v252_v26 = vadd.f32 %v352_v10, %v251_v24 }
  0x9e   : > { %260 = vst.msk [vmem:[%s172_s27 + $0x28] sm:$0xff] %vm254_vm1, %v246_v25 }
  0x9f   : > { %262 = vst.msk [vmem:[%s172_s27 + $0x38] sm:$0xff] %vm254_vm1, %v252_v26 }
  0xa0 PF: > { %s13_s12 = sadd.s32 1, %s359_s12  }
  0xa1   : > { %p10_p4 = scmp.ge.s32.totalorder %s13_s12, 4  }
  0xa3   :  { %12 = sbr.rel (!%p10_p4) target bundleno = 1 (0x1), region = 62 }

// kernel: _lambda_.6
= control target key start
LH: loop header
LB: loop body
LE: loop exit
PB: predicated region body
PF: predicated region fallthrough
CT: control target
= control target key end

     0   :  { %s993_s17 = smov 0   ;;  %s1116_s0 = inlined_call_operand.vmem [shape: f32[48,32], index: 0, kind: input, shape index: {}]   ;;  %s1117_s1 = inlined_call_operand.vmem [shape: f32[32,80], index: 1, kind: input, shape index: {}]   ;;  %s1118_s2 = inlined_call_operand.vmem [shape: f32[1,80], index: 2, kind: input, shape index: {}]   ;;  %s1119_s3 = inlined_call_operand.vmem [shape: f32[32,32], index: 3, kind: input, shape index: {}]   ;;  %s1120_s4 = inlined_call_operand.vmem [shape: f32[1,32], index: 4, kind: input, shape index: {}]   ;;  %s1121_s5 = inlined_call_operand.vmem [shape: f32[32,4], index: 5, kind: input, shape index: {}]   ;;  %s1122_s6 = inlined_call_operand.vmem [shape: f32[1,4], index: 6, kind: input, shape index: {}]   ;;  %s1123_s7 = inlined_call_operand.vmem [shape: f32[32,32], index: 7, kind: input, shape index: {}]   ;;  %s1124_s8 = inlined_call_operand.vmem [shape: f32[1,32], index: 8, kind: input, shape index: {}]   ;;  %s1125_s9 = inlined_call_operand.vmem [shape: f32[32,4], index: 9, kind: input, shape index: {}]   ;;  %s1126_s10 = inlined_call_operand.vmem [shape: f32[1,4], index: 10, kind: input, shape index: {}]   ;;  %s1127_s11 = inlined_call_operand.vmem [shape: f32[48,128], index: 11, kind: output, shape index: {}]  }
   0x1 LB: > { %s842_s18 = sadd.s32 4294967295, %s927_s17   ;;  %p846_p0 = scmp.ge.s32.totalorder %s927_s17, 1  ;;  %s927_s17 = sphi %s993_s17, %s21_s17  }
   0x2   : > { %p338_p1 = scmp.lt.s32.totalorder %s927_s17, 3 }
   0x4   : > { %p339_p2 = pnand %p846_p0, %p338_p1 }
   0x5   : > { %s378_s23 = smul.u32 (!%p339_p2), 3, %s842_s18  ;;  %s929_s25 = smov (!%p339_p2), 64  }
   0x6   : > { %342 = sbr.rel (%p339_p2) target bundleno = 682 (0x2aa), region = 64  ;;  %s930_s26 = smov (!%p339_p2), 96  }
   0x7   : > { %p379_p3 = scmp.lt.s32.totalorder (!%p339_p2), %s378_s23, 5  ;;  %s932_s29 = smov (!%p339_p2), 20  }
   0xb   : > { %v396_v0 = vld [vmem:[%s1117_s1 + $0x18] sm:$0xff]  ;;  %v395_v1 = vld [vmem:[%s1117_s1 + $0x10] sm:$0xff]  ;;  %v394_v2 = vld [vmem:[%s1117_s1 + $0x8] sm:$0xff]  ;;  %s1129_s23 = smov (!%p379_p3, %s378_s23), 5  ;;  %vm401_vm0 = vcmask 261120  }
   0xc   : > { %423 = vmatpush.msra.mxu0 %v396_v0  ;;  %873 = vmatpush.msra.mxu2 %v396_v0  ;;  %v393_v3 = vld [vmem:[%s1117_s1] sm:$0xff]  ;;  %s847_s28 = sshll.u32 %s1129_s23, 3  ;;  %v443_v4 = vld [vmem:[%s1119_s3 + $0x18] sm:$0xff]  ;;  %v442_v8 = vld [vmem:[%s1119_s3 + $0x10] sm:$0xff] }
   0xd   : > { %872 = vmatpush.msra.mxu1 %v396_v0  ;;  %s382_s12 = scalar_lea.vmem %s1116_s0, %s847_s28  ;;  %v441_v9 = vld [vmem:[%s1119_s3 + $0x8] sm:$0xff]  ;;  %v440_v10 = vld [vmem:[%s1119_s3] sm:$0xff]  ;;  %v589_v21 = vld [vmem:[%s1123_s7 + $0x18] sm:$0xff]  ;;  %s388_s13 = scalar_lea.vmem %s1127_s11, %s847_s28 }
   0xe   : > { %424 = vmatpush.msra.mxu0 %v395_v1  ;;  %875 = vmatpush.msra.mxu2 %v395_v1  ;;  %v390_v5 = vld [vmem:[%s382_s12] sm:$0xff]  ;;  %v392_v6 = vld [vmem:[%s382_s12 + $0x10] sm:$0xff]  ;;  %v391_v7 = vld [vmem:[%s382_s12 + $0x8] sm:$0xff] }
   0xf   : > { %874 = vmatpush.msra.mxu1 %v395_v1  ;;  %v892_v11 = vld [vmem:[%s1118_s2] ss:$0 sm:$0xff]  ;;  %v588_v22 = vld [vmem:[%s1123_s7 + $0x10] sm:$0xff]  ;;  %618 = vmatpush.msra.mxu3 %v589_v21  ;;  %v587_v23 = vld [vmem:[%s1123_s7 + $0x8] sm:$0xff] }
  0x10   : > { %425 = vmatpush.msra.mxu0 %v394_v2  ;;  %877 = vmatpush.msra.mxu2 %v394_v2  ;;  %v586_v24 = vld [vmem:[%s1123_s7] sm:$0xff]  ;;  %v489_v25 = vld [vmem:[%s1121_s5 + $0x18] sm:$0xff]  ;;  %v488_v26 = vld [vmem:[%s1121_s5 + $0x10] sm:$0xff] }
  0x11   : > { %876 = vmatpush.msra.mxu1 %v394_v2  ;;  %619 = vmatpush.msra.mxu3 %v588_v22  ;;  %v487_v27 = vld [vmem:[%s1121_s5 + $0x8] sm:$0xff]  ;;  %v486_v28 = vld [vmem:[%s1121_s5] sm:$0xff]  ;;  %v638_v30 = vld [vmem:[%s1125_s9 + $0x18] sm:$0xff] }
  0x12   : > { %426 = vmatpush.msra.mxu0 %v393_v3  ;;  %879 = vmatpush.msra.mxu2 %v393_v3  ;;  %v637_v31 = vld [vmem:[%s1125_s9 + $0x10] sm:$0xff]  ;;  %v893_v33 = vld [vmem:[%s1120_s4] ss:$0 sm:$0xff]  ;;  %v636_v44 = vld [vmem:[%s1125_s9 + $0x8] sm:$0xff] }
  0x13   : > { %878 = vmatpush.msra.mxu1 %v393_v3  ;;  %849 = vmatmul.msk.f32.vlgmr.msra.gmra.mxu0 %vm401_vm0, %v390_v5  ;;  %v635_v45 = vld [vmem:[%s1125_s9] sm:$0xff] }
  0x14   : > { %851 = vmatmul.msk.f32.vlgmr.msra.gmra.mxu2 %vm401_vm0, %v392_v6  ;;  %850 = vmatmul.msk.f32.vlgmr.msra.gmra.mxu1 %vm401_vm0, %v391_v7  ;;  %v894_v46 = vld [vmem:[%s1124_s8] ss:$0 sm:$0xff] }
  0x15   : > { %469 = vmatpush.msrb.mxu1 %v443_v4  ;;  %620 = vmatpush.msra.mxu3 %v587_v23  ;;  %v895_v53 = vld [vmem:[%s1122_s6] ss:$0 sm:$0xff] }
  0x16   : > { %515 = vmatpush.msrb.mxu2 %v489_v25  ;;  %664 = vmatpush.msrb.mxu0 %v638_v30 }
  0x17   : > { %470 = vmatpush.msrb.mxu1 %v442_v8  ;;  %621 = vmatpush.msra.mxu3 %v586_v24 }
  0x18   : > { %516 = vmatpush.msrb.mxu2 %v488_v26  ;;  %665 = vmatpush.msrb.mxu0 %v637_v31 }
  0x19   : > { %471 = vmatpush.msrb.mxu1 %v441_v9 }
  0x1a   : > { %517 = vmatpush.msrb.mxu2 %v487_v27  ;;  %666 = vmatpush.msrb.mxu0 %v636_v44 }
  0x1b   : > { %472 = vmatpush.msrb.mxu1 %v440_v10 }
  0x1c   : > { %518 = vmatpush.msrb.mxu2 %v486_v28  ;;  %667 = vmatpush.msrb.mxu0 %v635_v45 }
  0x90   : > { %v428_v12 = vpop.f32.mrf.mxu0 }
  0x91   : > { %v429_v13 = vadd.f32 %v892_v11, %v428_v12  ;;  %v431_v14 = vpop.f32.mrf.mxu1 }
  0x92   : > { %v432_v15 = vadd.f32 %v892_v11, %v431_v14 }
  0x93   : > { %v437_v16 = vmax.f32 %v429_v13, 0.0 }
  0x94   : > { %740 = vrot.lane.b32.xlu2 %v432_v15, %s929_s25  ;;  %v438_v19 = vmax.f32 %v432_v15, 0.0 }
  0x95   : > { %594 = vrot.lane.b32.xlu0 %v437_v16, %s930_s26  ;;  %852 = vmatmul.msk.f32.vlgmr.msrb.gmra.mxu1 %vm401_vm0, %v437_v16 }
  0x97   : > { %v434_v17 = vpop.f32.mrf.mxu2 }
  0x98   : > { %v435_v18 = vadd.f32 %v892_v11, %v434_v17 }
  0x9a   : > { %v439_v20 = vmax.f32 %v435_v18, 0.0 }
  0x9c   : > { %598 = vrot.lane.b32.xlu1 %v439_v20, %s930_s26  ;;  %742 = vrot.lane.b32.xlu2 %v435_v18, %s929_s25 }
  0x9d   : > { %596 = vrot.lane.b32.xlu0 %v438_v19, %s930_s26  ;;  %853 = vmatmul.msk.f32.gmra.mxu1 %vm401_vm0, %v438_v19 }
  0xa4   : > { %738 = vrot.lane.b32.xlu1 %v429_v13, %s929_s25  ;;  %s931_s25 = smov 16  }
  0xa5   : > { %854 = vmatmul.msk.f32.gmra.mxu1 %vm401_vm0, %v439_v20 }
 0x107   : > { %v595_v29 = vpop.permute.xlu0 %594 }
 0x108   : > { %861 = vmatmul.msk.f32.vlgmr.msra.gmra.mxu3 %vm401_vm0, %v595_v29 }
 0x10e   : > { %v599_v37 = vpop.permute.xlu1 %598 }
 0x10f   : > { %v597_v32 = vpop.permute.xlu0 %596 }
 0x110   : > { %862 = vmatmul.msk.f32.gmra.mxu3 %vm401_vm0, %v597_v32 }
 0x112   : > { %v474_v34 = vpop.f32.mrf.mxu1 }
 0x113   : > { %v475_v35 = vadd.f32 %v893_v33, %v474_v34 }
 0x115   : > { %v483_v36 = vmax.f32 %v475_v35, 0.0 }
 0x117   : > { %855 = vmatmul.msk.f32.vlgmr.msrb.gmra.mxu2 %vm401_vm0, %v483_v36 }
 0x118   : > { %863 = vmatmul.msk.f32.gmra.mxu3 %vm401_vm0, %v599_v37 }
 0x11a   : > { %v477_v38 = vpop.f32.mrf.mxu1 }
 0x11b   : > { %v478_v39 = vadd.f32 %v893_v33, %v477_v38  ;;  %v896_v38 = vld [vmem:[%s1126_s10] ss:$0 sm:$0xff] }
 0x11d   : > { %v484_v40 = vmax.f32 %v478_v39, 0.0 }
 0x11f   : > { %856 = vmatmul.msk.f32.gmra.mxu2 %vm401_vm0, %v484_v40 }
 0x122   : > { %v480_v41 = vpop.f32.mrf.mxu1 }
 0x123   : > { %v481_v42 = vadd.f32 %v893_v33, %v480_v41 }
 0x125   : > { %v485_v43 = vmax.f32 %v481_v42, 0.0 }
 0x127   : > { %857 = vmatmul.msk.f32.gmra.mxu2 %vm401_vm0, %v485_v43 }
 0x18b   : > { %v623_v47 = vpop.f32.mrf.mxu3 }
 0x18c   : > { %v624_v48 = vadd.f32 %v894_v46, %v623_v47 }
 0x18e   : > { %v632_v49 = vmax.f32 %v624_v48, 0.0 }
 0x190   : > { %864 = vmatmul.msk.f32.vlgmr.msrb.gmra.mxu0 %vm401_vm0, %v632_v49 }
 0x193   : > { %v626_v50 = vpop.f32.mrf.mxu3 }
 0x194   : > { %v627_v51 = vadd.f32 %v894_v46, %v626_v50 }
 0x196   : > { %v633_v52 = vmax.f32 %v627_v51, 0.0 }
 0x198   : > { %865 = vmatmul.msk.f32.gmra.mxu0 %vm401_vm0, %v633_v52 }
 0x19a   : > { %v520_v54 = vpop.f32.mrf.mxu2 }
 0x19b   : > { %v521_v55 = vadd.f32 %v895_v53, %v520_v54  ;;  %v629_v56 = vpop.f32.mrf.mxu3 }
 0x19c   : > { %v630_v57 = vadd.f32 %v894_v46, %v629_v56 }
 0x19d   : > { %v858_v58 = vmul.f32 -1.442695, %v521_v55 }
 0x19e   : > { %v634_v59 = vmax.f32 %v630_v57, 0.0 }
 0x19f   : > { %897 = vpow2.f32 %v858_v58 }
 0x1a0   : > { %866 = vmatmul.msk.f32.gmra.mxu0 %vm401_vm0, %v634_v59 }
 0x1a2   : > { %v523_v60 = vpop.f32.mrf.mxu2 }
 0x1a3   : > { %v524_v61 = vadd.f32 %v895_v53, %v523_v60 }
 0x1a5   : > { %v898_v62 = vpop.eup %897  ;;  %v859_v63 = vmul.f32 -1.442695, %v524_v61 }
 0x1a6   : > { %v538_v0 = vadd.f32 1.0, %v898_v62 }
 0x1a7   : > { %899 = vpow2.f32 %v859_v63 }
 0x1a8   : > { %901 = vrcp.f32 %v538_v0  ;;  %v552_v9 = vand.u32 2147483648, %v538_v0  ;;  %v550_v11 = vand.u32 2147483647, %v538_v0  ;;  %vm546_vm2 = vweird.f32 %v538_v0 }
 0x1aa   : > { %v526_v1 = vpop.f32.mrf.mxu2  ;;  %v553_v16 = vor.u32 1.1754944e-38, %v552_v9  ;;  %vm551_vm4 = vcmp.eq.f32.partialorder %v550_v11, 8.507059e+37 }
 0x1ab   : > { %v527_v2 = vadd.f32 %v895_v53, %v526_v1 }
 0x1ad   : > { %v900_v3 = vpop.eup %899  ;;  %v860_v4 = vmul.f32 -1.442695, %v527_v2 }
 0x1ae   : > { %v902_v5 = vpop.eup %901  ;;  %v539_v6 = vadd.f32 1.0, %v900_v3 }
 0x1af   : > { %903 = vpow2.f32 %v860_v4  ;;  %v542_v7 = vmul.f32 %v902_v5, %v538_v0  ;;  %vm547_vm1 = vweird.f32 %v902_v5 }
 0x1b0   : > { %905 = vrcp.f32 %v539_v6  ;;  %vm548_vm3 = vmor %vm546_vm2, %vm547_vm1  ;;  %v567_v21 = vand.u32 2147483648, %v539_v6  ;;  %v565_v23 = vand.u32 2147483647, %v539_v6  ;;  %vm561_vm6 = vweird.f32 %v539_v6 }
 0x1b1   : > { %v543_v8 = vsub.f32 1.0, %v542_v7 }
 0x1b2   : > { %v568_v26 = vor.u32 1.1754944e-38, %v567_v21  ;;  %vm566_vm8 = vcmp.eq.f32.partialorder %v565_v23, 8.507059e+37  ;;  %v739_v23 = vpop.permute.xlu1 %738 }
 0x1b3   : > { %v544_v10 = vmul.f32 %v902_v5, %v543_v8 }
 0x1b5   : > { %v904_v12 = vpop.eup %903  ;;  %v545_v13 = vadd.f32 %v902_v5, %v544_v10 }
 0x1b6   : > { %v906_v14 = vpop.eup %905  ;;  %v540_v15 = vadd.f32 1.0, %v904_v12 }
 0x1b7   : > { %v549_v17 = vsel %vm548_vm3, %v902_v5, %v545_v13  ;;  %v557_v18 = vmul.f32 %v906_v14, %v539_v6  ;;  %vm562_vm5 = vweird.f32 %v906_v14 }
 0x1b8   : > { %907 = vrcp.f32 %v540_v15  ;;  %v554_v19 = vsel %vm551_vm4, %v553_v16, %v549_v17  ;;  %vm563_vm7 = vmor %vm561_vm6, %vm562_vm5  ;;  %v582_v30 = vand.u32 2147483648, %v540_v15  ;;  %vm576_vm9 = vweird.f32 %v540_v15 }
 0x1b9   : > { %750 = vrot.lane.b32.xlu0 %v554_v19, %s931_s25  ;;  %v558_v20 = vsub.f32 1.0, %v557_v18  ;;  %v580_v32 = vand.u32 2147483647, %v540_v15 }
 0x1ba   : > { %v583_v34 = vor.u32 1.1754944e-38, %v582_v30 }
 0x1bb   : > { %v559_v22 = vmul.f32 %v906_v14, %v558_v20  ;;  %vm581_vm12 = vcmp.eq.f32.partialorder %v580_v32, 8.507059e+37  ;;  %v741_v20 = vpop.permute.xlu2 %740 }
 0x1bd   : > { %v560_v24 = vadd.f32 %v906_v14, %v559_v22 }
 0x1be   : > { %v908_v25 = vpop.eup %907 }
 0x1bf   : > { %v564_v27 = vsel %vm563_vm7, %v906_v14, %v560_v24  ;;  %v572_v28 = vmul.f32 %v908_v25, %v540_v15  ;;  %vm577_vm10 = vweird.f32 %v908_v25 }
 0x1c0   : > { %v569_v29 = vsel %vm566_vm8, %v568_v26, %v564_v27  ;;  %vm578_vm11 = vmor %vm576_vm9, %vm577_vm10  ;;  %vm771_vm9 = vcmask 130048   ;;  %vm775_vm10 = vcmask 162816  }
 0x1c1   : > { %752 = vrot.lane.b32.xlu1 %v569_v29, %s931_s25  ;;  %v573_v31 = vsub.f32 1.0, %v572_v28 }
 0x1c3   : > { %v574_v33 = vmul.f32 %v908_v25, %v573_v31  ;;  %v743_v21 = vpop.permute.xlu2 %742 }
 0x1c5   : > { %v575_v35 = vadd.f32 %v908_v25, %v574_v33 }
 0x1c7   : > { %v579_v36 = vsel %vm578_vm11, %v908_v25, %v575_v35  ;;  %vm779_vm11 = vcmask 195584  }
 0x1c8   : > { %v584_v37 = vsel %vm581_vm12, %v583_v34, %v579_v36 }
 0x1c9   : > { %754 = vrot.lane.b32.xlu2 %v584_v37, %s931_s25 }
 0x20d   : > { %v669_v39 = vpop.f32.mrf.mxu0 }
 0x20e   : > { %v670_v40 = vadd.f32 %v896_v38, %v669_v39 }
 0x210   : > { %v867_v41 = vmul.f32 -1.442695, %v670_v40 }
 0x212   : > { %909 = vpow2.f32 %v867_v41 }
 0x215   : > { %v672_v42 = vpop.f32.mrf.mxu0 }
 0x216   : > { %v673_v43 = vadd.f32 %v896_v38, %v672_v42 }
 0x218   : > { %v910_v44 = vpop.eup %909  ;;  %v868_v45 = vmul.f32 -1.442695, %v673_v43 }
 0x219   : > { %v687_v46 = vadd.f32 1.0, %v910_v44 }
 0x21a   : > { %911 = vpow2.f32 %v868_v45 }
 0x21b   : > { %913 = vrcp.f32 %v687_v46  ;;  %v701_v55 = vand.u32 2147483648, %v687_v46  ;;  %v699_v57 = vand.u32 2147483647, %v687_v46  ;;  %vm695_vm14 = vweird.f32 %v687_v46 }
 0x21d   : > { %v675_v47 = vpop.f32.mrf.mxu0  ;;  %v702_v62 = vor.u32 1.1754944e-38, %v701_v55  ;;  %vm700_vm0 = vcmp.eq.f32.partialorder %v699_v57, 8.507059e+37 }
 0x21e   : > { %v676_v48 = vadd.f32 %v896_v38, %v675_v47 }
 0x220   : > { %v912_v49 = vpop.eup %911  ;;  %v869_v50 = vmul.f32 -1.442695, %v676_v48 }
 0x221   : > { %v914_v51 = vpop.eup %913  ;;  %v688_v52 = vadd.f32 1.0, %v912_v49 }
 0x222   : > { %915 = vpow2.f32 %v869_v50  ;;  %v691_v53 = vmul.f32 %v914_v51, %v687_v46  ;;  %vm696_vm13 = vweird.f32 %v914_v51 }
 0x223   : > { %917 = vrcp.f32 %v688_v52  ;;  %vm697_vm15 = vmor %vm695_vm14, %vm696_vm13  ;;  %v716_v3 = vand.u32 2147483648, %v688_v52  ;;  %v714_v5 = vand.u32 2147483647, %v688_v52  ;;  %vm710_vm2 = vweird.f32 %v688_v52  ;;  %v755_v22 = vpop.permute.xlu2 %754 }
 0x224   : > { %v692_v54 = vsub.f32 1.0, %v691_v53  ;;  %v774_v24 = vsel %vm771_vm9, %v743_v21, %v755_v22 }
 0x225   : > { %v717_v8 = vor.u32 1.1754944e-38, %v716_v3  ;;  %vm715_vm4 = vcmp.eq.f32.partialorder %v714_v5, 8.507059e+37 }
 0x226   : > { %v693_v56 = vmul.f32 %v914_v51, %v692_v54 }
 0x228   : > { %v916_v58 = vpop.eup %915  ;;  %v694_v59 = vadd.f32 %v914_v51, %v693_v56 }
 0x229   : > { %v918_v60 = vpop.eup %917  ;;  %v689_v61 = vadd.f32 1.0, %v916_v58 }
 0x22a   : > { %v698_v63 = vsel %vm697_vm15, %v914_v51, %v694_v59  ;;  %v706_v0 = vmul.f32 %v918_v60, %v688_v52  ;;  %vm711_vm1 = vweird.f32 %v918_v60 }
 0x22b   : > { %919 = vrcp.f32 %v689_v61  ;;  %v703_v1 = vsel %vm700_vm0, %v702_v62, %v698_v63  ;;  %vm712_vm3 = vmor %vm710_vm2, %vm711_vm1  ;;  %v731_v12 = vand.u32 2147483648, %v689_v61  ;;  %vm725_vm5 = vweird.f32 %v689_v61  ;;  %v751_v25 = vpop.permute.xlu0 %750 }
 0x22c   : > { %762 = vrot.lane.b32.xlu0 %v703_v1, %s932_s29  ;;  %v707_v2 = vsub.f32 1.0, %v706_v0  ;;  %v729_v14 = vand.u32 2147483647, %v689_v61  ;;  %v772_v29 = vsel %vm771_vm9, %v739_v23, %v751_v25 }
 0x22d   : > { %v732_v16 = vor.u32 1.1754944e-38, %v731_v12 }
 0x22e   : > { %v708_v4 = vmul.f32 %v918_v60, %v707_v2  ;;  %vm730_vm8 = vcmp.eq.f32.partialorder %v729_v14, 8.507059e+37 }
 0x230   : > { %v709_v6 = vadd.f32 %v918_v60, %v708_v4 }
 0x231   : > { %v920_v7 = vpop.eup %919 }
 0x232   : > { %v713_v9 = vsel %vm712_vm3, %v918_v60, %v709_v6  ;;  %v721_v10 = vmul.f32 %v920_v7, %v689_v61  ;;  %vm726_vm6 = vweird.f32 %v920_v7 }
 0x233   : > { %v718_v11 = vsel %vm715_vm4, %v717_v8, %v713_v9  ;;  %vm727_vm7 = vmor %vm725_vm5, %vm726_vm6  ;;  %v753_v30 = vpop.permute.xlu1 %752 }
 0x234   : > { %764 = vrot.lane.b32.xlu1 %v718_v11, %s932_s29  ;;  %v722_v13 = vsub.f32 1.0, %v721_v10  ;;  %v773_v34 = vsel %vm771_vm9, %v741_v20, %v753_v30 }
 0x236   : > { %v723_v15 = vmul.f32 %v920_v7, %v722_v13 }
 0x238   : > { %v724_v17 = vadd.f32 %v920_v7, %v723_v15 }
 0x23a   : > { %v728_v18 = vsel %vm727_vm7, %v920_v7, %v724_v17 }
 0x23b   : > { %v733_v19 = vsel %vm730_vm8, %v732_v16, %v728_v18 }
 0x23c   : > { %766 = vrot.lane.b32.xlu2 %v733_v19, %s932_s29 }
 0x296   : > { %v767_v26 = vpop.permute.xlu2 %766 }
 0x297   : > { %v778_v27 = vsel %vm775_vm10, %v774_v24, %v767_v26 }
 0x298   : > { %v782_v28 = vsel %vm779_vm11, %v778_v27, 0.0 }
 0x299   : > { %785 = vst [vmem:[%s388_s13 + $0x10] sm:$0xff] %v782_v28 }
 0x29e   : > { %v763_v31 = vpop.permute.xlu0 %762 }
 0x29f   : > { %v776_v32 = vsel %vm775_vm10, %v772_v29, %v763_v31 }
 0x2a0   : > { %v780_v33 = vsel %vm779_vm11, %v776_v32, 0.0 }
 0x2a1   : > { %783 = vst [vmem:[%s388_s13] sm:$0xff] %v780_v33 }
 0x2a6   : > { %v765_v35 = vpop.permute.xlu1 %764 }
 0x2a7   : > { %v777_v36 = vsel %vm775_vm10, %v773_v34, %v765_v35 }
 0x2a8   : > { %v781_v37 = vsel %vm779_vm11, %v777_v36, 0.0 }
 0x2a9   : > { %784 = vst [vmem:[%s388_s13 + $0x8] sm:$0xff] %v781_v37 }
 0x2aa PF: > { %s21_s17 = sadd.s32 1, %s927_s17  }
 0x2ab   : > { %p18_p4 = scmp.ge.s32.totalorder %s21_s17, 4  }
 0x2ad   :  { %20 = sbr.rel (!%p18_p4) target bundleno = 1 (0x1), region = 94 }

// kernel: _lambda_.7
= control target key start
LH: loop header
LB: loop body
LE: loop exit
PB: predicated region body
PF: predicated region fallthrough
CT: control target
= control target key end

     0   :  { %s669_s24 = smov 0   ;;  %s747_s0 = inlined_call_operand.vmem [shape: f32[48,32], index: 0, kind: input, shape index: {}]   ;;  %s748_s1 = inlined_call_operand.vmem [shape: f32[32,40], index: 1, kind: input, shape index: {}]   ;;  %s749_s2 = inlined_call_operand.vmem [shape: f32[1,40], index: 2, kind: input, shape index: {}]   ;;  %s750_s3 = inlined_call_operand.vmem [shape: f32[32,32], index: 3, kind: input, shape index: {}]   ;;  %s751_s4 = inlined_call_operand.vmem [shape: f32[1,32], index: 4, kind: input, shape index: {}]   ;;  %s752_s5 = inlined_call_operand.vmem [shape: f32[32,4], index: 5, kind: input, shape index: {}]   ;;  %s753_s6 = inlined_call_operand.vmem [shape: f32[1,4], index: 6, kind: input, shape index: {}]   ;;  %s754_s7 = inlined_call_operand.vmem [shape: f32[48,128], index: 7, kind: output, shape index: {}]  }
   0x1 LB: > { %s569_s25 = sadd.s32 4294967295, %s625_s24   ;;  %p573_p0 = scmp.ge.s32.totalorder %s625_s24, 1  ;;  %s625_s24 = sphi %s669_s24, %s17_s24  }
   0x2   : > { %p238_p1 = scmp.lt.s32.totalorder %s625_s24, 3 }
   0x4   : > { %p239_p2 = pnand %p573_p0, %p238_p1 }
   0x5   : > { %s270_s30 = smul.u32 (!%p239_p2), 3, %s569_s25  ;;  %s627_s27 = smov (!%p239_p2), 96  }
   0x6   : > { %242 = sbr.rel (%p239_p2) target bundleno = 559 (0x22f), region = 48  ;;  %s628_s19 = smov (!%p239_p2), 8  }
   0x7   : > { %p271_p3 = scmp.lt.s32.totalorder (!%p239_p2), %s270_s30, 5 }
   0xb   : > { %v288_v0 = vld [vmem:[%s748_s1 + $0x18] sm:$0xff]  ;;  %v287_v1 = vld [vmem:[%s748_s1 + $0x10] sm:$0xff]  ;;  %v286_v3 = vld [vmem:[%s748_s1 + $0x8] sm:$0xff]  ;;  %s756_s30 = smov (!%p271_p3, %s270_s30), 5  ;;  %vm293_vm0 = vcmask 261120   ;;  %vm502_vm13 = vcmask 64512  }
   0xc   : > { %315 = vmatpush.msra.mxu0 %v288_v0  ;;  %590 = vmatpush.msra.mxu3 %v288_v0  ;;  %v335_v2 = vld [vmem:[%s750_s3 + $0x18] sm:$0xff]  ;;  %v285_v4 = vld [vmem:[%s748_s1] sm:$0xff]  ;;  %s574_s14 = sshll.u32 %s756_s30, 3  ;;  %v334_v8 = vld [vmem:[%s750_s3 + $0x10] sm:$0xff]  ;;  %vm506_vm14 = vcmask 97280  }
   0xd   : > { %361 = vmatpush.msra.mxu1 %v335_v2  ;;  %s274_s17 = scalar_lea.vmem %s747_s0, %s574_s14  ;;  %v333_v9 = vld [vmem:[%s750_s3 + $0x8] sm:$0xff]  ;;  %v332_v10 = vld [vmem:[%s750_s3] sm:$0xff]  ;;  %v381_v21 = vld [vmem:[%s752_s5 + $0x18] sm:$0xff]  ;;  %s280_s22 = scalar_lea.vmem %s754_s7, %s574_s14 }
   0xe   : > { %316 = vmatpush.msra.mxu0 %v287_v1  ;;  %591 = vmatpush.msra.mxu3 %v287_v1  ;;  %v282_v5 = vld [vmem:[%s274_s17] sm:$0xff]  ;;  %v283_v6 = vld [vmem:[%s274_s17 + $0x8] sm:$0xff]  ;;  %v284_v7 = vld [vmem:[%s274_s17 + $0x10] sm:$0xff] }
   0xf   : > { %362 = vmatpush.msra.mxu1 %v334_v8  ;;  %v604_v11 = vld [vmem:[%s749_s2] ss:$0 sm:$0xff]  ;;  %407 = vmatpush.msra.mxu2 %v381_v21  ;;  %v380_v22 = vld [vmem:[%s752_s5 + $0x10] sm:$0xff]  ;;  %v379_v23 = vld [vmem:[%s752_s5 + $0x8] sm:$0xff] }
  0x10   : > { %317 = vmatpush.msra.mxu0 %v286_v3  ;;  %592 = vmatpush.msra.mxu3 %v286_v3  ;;  %v378_v24 = vld [vmem:[%s752_s5] sm:$0xff] }
  0x11   : > { %363 = vmatpush.msra.mxu1 %v333_v9  ;;  %408 = vmatpush.msra.mxu2 %v380_v22  ;;  %v605_v25 = vld [vmem:[%s751_s4] ss:$0 sm:$0xff] }
  0x12   : > { %318 = vmatpush.msra.mxu0 %v285_v4  ;;  %593 = vmatpush.msra.mxu3 %v285_v4  ;;  %v606_v35 = vld [vmem:[%s753_s6] ss:$0 sm:$0xff] }
  0x13   : > { %576 = vmatmul.msk.f32.vlgmr.msra.gmra.mxu0 %vm293_vm0, %v282_v5  ;;  %577 = vmatmul.msk.f32.vlgmr.msra.gmra.mxu3 %vm293_vm0, %v283_v6 }
  0x14   : > { %364 = vmatpush.msra.mxu1 %v332_v10  ;;  %409 = vmatpush.msra.mxu2 %v379_v23 }
  0x16   : > { %410 = vmatpush.msra.mxu2 %v378_v24 }
  0x1b   : > { %578 = vmatmul.msk.f32.gmra.mxu3 %vm293_vm0, %v284_v7 }
  0x90   : > { %v320_v12 = vpop.f32.mrf.mxu0 }
  0x91   : > { %v321_v13 = vadd.f32 %v604_v11, %v320_v12 }
  0x93   : > { %v329_v14 = vmax.f32 %v321_v13, 0.0  ;;  %481 = vrot.lane.b32.xlu0 %v321_v13, %s627_s27 }
  0x95   : > { %579 = vmatmul.msk.f32.vlgmr.msra.gmra.mxu1 %vm293_vm0, %v329_v14 }
  0x96   : > { %v323_v15 = vpop.f32.mrf.mxu3 }
  0x97   : > { %v324_v16 = vadd.f32 %v604_v11, %v323_v15 }
  0x99   : > { %v330_v17 = vmax.f32 %v324_v16, 0.0 }
  0x9b   : > { %483 = vrot.lane.b32.xlu0 %v324_v16, %s627_s27 }
  0x9d   : > { %580 = vmatmul.msk.f32.gmra.mxu1 %vm293_vm0, %v330_v17 }
  0x9e   : > { %v326_v18 = vpop.f32.mrf.mxu3 }
  0x9f   : > { %v327_v19 = vadd.f32 %v604_v11, %v326_v18 }
  0xa1   : > { %v331_v20 = vmax.f32 %v327_v19, 0.0  ;;  %485 = vrot.lane.b32.xlu1 %v327_v19, %s627_s27 }
  0xa5   : > { %581 = vmatmul.msk.f32.gmra.mxu1 %vm293_vm0, %v331_v20 }
 0x105   : > { %v482_v17 = vpop.permute.xlu0 %481 }
 0x10d   : > { %v484_v18 = vpop.permute.xlu0 %483 }
 0x112   : > { %v366_v26 = vpop.f32.mrf.mxu1 }
 0x113   : > { %v367_v27 = vadd.f32 %v605_v25, %v366_v26  ;;  %v486_v22 = vpop.permute.xlu1 %485 }
 0x115   : > { %v375_v28 = vmax.f32 %v367_v27, 0.0 }
 0x117   : > { %582 = vmatmul.msk.f32.vlgmr.msra.gmra.mxu2 %vm293_vm0, %v375_v28 }
 0x11a   : > { %v369_v29 = vpop.f32.mrf.mxu1 }
 0x11b   : > { %v370_v30 = vadd.f32 %v605_v25, %v369_v29 }
 0x11d   : > { %v376_v31 = vmax.f32 %v370_v30, 0.0 }
 0x11f   : > { %583 = vmatmul.msk.f32.gmra.mxu2 %vm293_vm0, %v376_v31 }
 0x122   : > { %v372_v32 = vpop.f32.mrf.mxu1 }
 0x123   : > { %v373_v33 = vadd.f32 %v605_v25, %v372_v32 }
 0x125   : > { %v377_v34 = vmax.f32 %v373_v33, 0.0 }
 0x127   : > { %584 = vmatmul.msk.f32.gmra.mxu2 %vm293_vm0, %v377_v34 }
 0x19a   : > { %v412_v36 = vpop.f32.mrf.mxu2 }
 0x19b   : > { %v413_v37 = vadd.f32 %v606_v35, %v412_v36 }
 0x19d   : > { %v585_v38 = vmul.f32 -1.442695, %v413_v37 }
 0x19f   : > { %607 = vpow2.f32 %v585_v38 }
 0x1a2   : > { %v415_v39 = vpop.f32.mrf.mxu2 }
 0x1a3   : > { %v416_v40 = vadd.f32 %v606_v35, %v415_v39 }
 0x1a5   : > { %v608_v41 = vpop.eup %607  ;;  %v586_v42 = vmul.f32 -1.442695, %v416_v40 }
 0x1a6   : > { %v430_v43 = vadd.f32 1.0, %v608_v41 }
 0x1a7   : > { %609 = vpow2.f32 %v586_v42 }
 0x1a8   : > { %611 = vrcp.f32 %v430_v43  ;;  %v444_v52 = vand.u32 2147483648, %v430_v43  ;;  %v442_v54 = vand.u32 2147483647, %v430_v43  ;;  %vm438_vm2 = vweird.f32 %v430_v43 }
 0x1aa   : > { %v418_v44 = vpop.f32.mrf.mxu2  ;;  %v445_v59 = vor.u32 1.1754944e-38, %v444_v52  ;;  %vm443_vm4 = vcmp.eq.f32.partialorder %v442_v54, 8.507059e+37 }
 0x1ab   : > { %v419_v45 = vadd.f32 %v606_v35, %v418_v44 }
 0x1ad   : > { %v610_v46 = vpop.eup %609  ;;  %v587_v47 = vmul.f32 -1.442695, %v419_v45 }
 0x1ae   : > { %v612_v48 = vpop.eup %611  ;;  %v431_v49 = vadd.f32 1.0, %v610_v46 }
 0x1af   : > { %613 = vpow2.f32 %v587_v47  ;;  %v434_v50 = vmul.f32 %v612_v48, %v430_v43  ;;  %vm439_vm1 = vweird.f32 %v612_v48 }
 0x1b0   : > { %615 = vrcp.f32 %v431_v49  ;;  %vm440_vm3 = vmor %vm438_vm2, %vm439_vm1  ;;  %v459_v0 = vand.u32 2147483648, %v431_v49  ;;  %vm453_vm5 = vweird.f32 %v431_v49  ;;  %v457_v2 = vand.u32 2147483647, %v431_v49 }
 0x1b1   : > { %v435_v51 = vsub.f32 1.0, %v434_v50 }
 0x1b2   : > { %v460_v5 = vor.u32 1.1754944e-38, %v459_v0  ;;  %vm458_vm8 = vcmp.eq.f32.partialorder %v457_v2, 8.507059e+37 }
 0x1b3   : > { %v436_v53 = vmul.f32 %v612_v48, %v435_v51 }
 0x1b5   : > { %v614_v55 = vpop.eup %613  ;;  %v437_v56 = vadd.f32 %v612_v48, %v436_v53 }
 0x1b6   : > { %v616_v57 = vpop.eup %615  ;;  %v432_v58 = vadd.f32 1.0, %v614_v55 }
 0x1b7   : > { %v441_v60 = vsel %vm440_vm3, %v612_v48, %v437_v56  ;;  %v449_v61 = vmul.f32 %v616_v57, %v431_v49  ;;  %vm454_vm6 = vweird.f32 %v616_v57 }
 0x1b8   : > { %617 = vrcp.f32 %v432_v58  ;;  %v446_v62 = vsel %vm443_vm4, %v445_v59, %v441_v60  ;;  %vm455_vm7 = vmor %vm453_vm5, %vm454_vm6  ;;  %v474_v10 = vand.u32 2147483648, %v432_v58  ;;  %vm468_vm9 = vweird.f32 %v432_v58 }
 0x1b9   : > { %493 = vrot.lane.b32.xlu1 %v446_v62, %s628_s19  ;;  %v450_v63 = vsub.f32 1.0, %v449_v61  ;;  %v472_v12 = vand.u32 2147483647, %v432_v58 }
 0x1ba   : > { %v475_v14 = vor.u32 1.1754944e-38, %v474_v10 }
 0x1bb   : > { %v451_v1 = vmul.f32 %v616_v57, %v450_v63  ;;  %vm473_vm12 = vcmp.eq.f32.partialorder %v472_v12, 8.507059e+37 }
 0x1bd   : > { %v452_v3 = vadd.f32 %v616_v57, %v451_v1 }
 0x1be   : > { %v618_v4 = vpop.eup %617 }
 0x1bf   : > { %v456_v6 = vsel %vm455_vm7, %v616_v57, %v452_v3  ;;  %v464_v7 = vmul.f32 %v618_v4, %v432_v58  ;;  %vm469_vm10 = vweird.f32 %v618_v4 }
 0x1c0   : > { %v461_v8 = vsel %vm458_vm8, %v460_v5, %v456_v6  ;;  %vm470_vm11 = vmor %vm468_vm9, %vm469_vm10 }
 0x1c1   : > { %495 = vrot.lane.b32.xlu2 %v461_v8, %s628_s19  ;;  %v465_v9 = vsub.f32 1.0, %v464_v7 }
 0x1c3   : > { %v466_v11 = vmul.f32 %v618_v4, %v465_v9 }
 0x1c5   : > { %v467_v13 = vadd.f32 %v618_v4, %v466_v11 }
 0x1c7   : > { %v471_v15 = vsel %vm470_vm11, %v618_v4, %v467_v13 }
 0x1c8   : > { %v476_v16 = vsel %vm473_vm12, %v475_v14, %v471_v15 }
 0x1c9   : > { %497 = vrot.lane.b32.xlu2 %v476_v16, %s628_s19 }
 0x21b   : > { %v496_v19 = vpop.permute.xlu2 %495 }
 0x21c   : > { %v504_v20 = vsel %vm502_vm13, %v484_v18, %v496_v19 }
 0x21d   : > { %v508_v21 = vsel %vm506_vm14, %v504_v20, 0.0 }
 0x21e   : > { %511 = vst [vmem:[%s280_s22 + $0x8] sm:$0xff] %v508_v21 }
 0x223   : > { %v498_v23 = vpop.permute.xlu2 %497 }
 0x224   : > { %v505_v24 = vsel %vm502_vm13, %v486_v22, %v498_v23 }
 0x225   : > { %v509_v25 = vsel %vm506_vm14, %v505_v24, 0.0 }
 0x226   : > { %512 = vst [vmem:[%s280_s22 + $0x10] sm:$0xff] %v509_v25 }
 0x22b   : > { %v494_v26 = vpop.permute.xlu1 %493 }
 0x22c   : > { %v503_v27 = vsel %vm502_vm13, %v482_v17, %v494_v26 }
 0x22d   : > { %v507_v28 = vsel %vm506_vm14, %v503_v27, 0.0 }
 0x22e   : > { %510 = vst [vmem:[%s280_s22] sm:$0xff] %v507_v28 }
 0x22f PF: > { %s17_s24 = sadd.s32 1, %s625_s24  }
 0x230   : > { %p14_p4 = scmp.ge.s32.totalorder %s17_s24, 4  }
 0x232   :  { %16 = sbr.rel (!%p14_p4) target bundleno = 1 (0x1), region = 78 }

// kernel: _lambda_.8
= control target key start
LH: loop header
LB: loop body
LE: loop exit
PB: predicated region body
PF: predicated region fallthrough
CT: control target
= control target key end

     0   :  { %s341_s12 = smov 0   ;;  %s373_s0 = inlined_call_operand.vmem [shape: f32[48,32], index: 0, kind: input, shape index: {}]   ;;  %s374_s1 = inlined_call_operand.vmem [shape: f32[32,8], index: 1, kind: input, shape index: {}]   ;;  %s375_s2 = inlined_call_operand.vmem [shape: f32[1,8], index: 2, kind: input, shape index: {}]   ;;  %s376_s3 = inlined_call_operand.vmem [shape: f32[48,128], index: 3, kind: output, shape index: {}]  }
   0x1 LB: > { %s284_s13 = sadd.s32 4294967295, %s319_s12   ;;  %p288_p0 = scmp.ge.s32.totalorder %s319_s12, 1  ;;  %s319_s12 = sphi %s341_s12, %s13_s12  }
   0x2   : > { %p138_p1 = scmp.lt.s32.totalorder %s319_s12, 3 }
   0x4   : > { %p139_p2 = pnand %p288_p0, %p138_p1 }
   0x5   : > { %s162_s18 = smul.u32 (!%p139_p2), 3, %s284_s13 }
   0x6   : > { %142 = sbr.rel (%p139_p2) target bundleno = 155 (0x9b), region = 32 }
   0x7   : > { %p163_p3 = scmp.lt.s32.totalorder (!%p139_p2), %s162_s18, 5 }
   0xb   : > { %v180_v0 = vld [vmem:[%s374_s1 + $0x18] sm:$0xff]  ;;  %v179_v1 = vld [vmem:[%s374_s1 + $0x10] sm:$0xff]  ;;  %v178_v2 = vld [vmem:[%s374_s1 + $0x8] sm:$0xff]  ;;  %s378_s18 = smov (!%p163_p3, %s162_s18), 5  ;;  %vm185_vm0 = vcmask 261120   ;;  %vm221_vm1 = vcmask 64512  }
   0xc   : > { %297 = vmatpush.msra.mxu2 %v180_v0  ;;  %207 = vmatpush.msra.mxu0 %v180_v0  ;;  %v177_v3 = vld [vmem:[%s374_s1] sm:$0xff]  ;;  %s289_s23 = sshll.u32 %s378_s18, 3 }
   0xd   : > { %296 = vmatpush.msra.mxu1 %v180_v0  ;;  %s166_s26 = scalar_lea.vmem %s373_s0, %s289_s23  ;;  %v312_v7 = vld [vmem:[%s375_s2] ss:$0 sm:$0xff]  ;;  %s172_s4 = scalar_lea.vmem %s376_s3, %s289_s23 }
   0xe   : > { %299 = vmatpush.msra.mxu2 %v179_v1  ;;  %208 = vmatpush.msra.mxu0 %v179_v1  ;;  %v176_v4 = vld [vmem:[%s166_s26 + $0x10] sm:$0xff]  ;;  %v174_v5 = vld [vmem:[%s166_s26] sm:$0xff]  ;;  %v175_v6 = vld [vmem:[%s166_s26 + $0x8] sm:$0xff] }
   0xf   : > { %298 = vmatpush.msra.mxu1 %v179_v1 }
  0x10   : > { %301 = vmatpush.msra.mxu2 %v178_v2  ;;  %209 = vmatpush.msra.mxu0 %v178_v2 }
  0x11   : > { %300 = vmatpush.msra.mxu1 %v178_v2 }
  0x12   : > { %303 = vmatpush.msra.mxu2 %v177_v3  ;;  %210 = vmatpush.msra.mxu0 %v177_v3 }
  0x13   : > { %302 = vmatpush.msra.mxu1 %v177_v3  ;;  %293 = vmatmul.msk.f32.vlgmr.msra.gmra.mxu2 %vm185_vm0, %v176_v4 }
  0x14   : > { %291 = vmatmul.msk.f32.vlgmr.msra.gmra.mxu0 %vm185_vm0, %v174_v5  ;;  %292 = vmatmul.msk.f32.vlgmr.msra.gmra.mxu1 %vm185_vm0, %v175_v6 }
  0x91   : > { %v212_v8 = vpop.f32.mrf.mxu0  ;;  %v215_v10 = vpop.f32.mrf.mxu1 }
  0x92   : > { %v213_v9 = vadd.f32 %v312_v7, %v212_v8  ;;  %v216_v11 = vadd.f32 %v312_v7, %v215_v10 }
  0x94   : > { %v222_v12 = vsel %vm221_vm1, %v213_v9, 0.0  ;;  %v223_v13 = vsel %vm221_vm1, %v216_v11, 0.0 }
  0x95   : > { %225 = vst [vmem:[%s172_s4] sm:$0xff] %v222_v12 }
  0x96   : > { %226 = vst [vmem:[%s172_s4 + $0x8] sm:$0xff] %v223_v13  ;;  %v218_v14 = vpop.f32.mrf.mxu2 }
  0x97   : > { %v219_v15 = vadd.f32 %v312_v7, %v218_v14 }
  0x99   : > { %v224_v16 = vsel %vm221_vm1, %v219_v15, 0.0 }
  0x9a   : > { %227 = vst [vmem:[%s172_s4 + $0x10] sm:$0xff] %v224_v16 }
  0x9b PF: > { %s13_s12 = sadd.s32 1, %s319_s12  }
  0x9c   : > { %p10_p4 = scmp.ge.s32.totalorder %s13_s12, 4  }
  0x9e   :  { %12 = sbr.rel (!%p10_p4) target bundleno = 1 (0x1), region = 62 }

// kernel: _lambda_.9
= control target key start
LH: loop header
LB: loop body
LE: loop exit
PB: predicated region body
PF: predicated region fallthrough
CT: control target
= control target key end

     0   :  { %s637_s24 = smov 0   ;;  %s723_s0 = inlined_call_operand.vmem [shape: f32[48,32], index: 0, kind: input, shape index: {}]   ;;  %s724_s1 = inlined_call_operand.vmem [shape: f32[32,32], index: 1, kind: input, shape index: {}]   ;;  %s725_s2 = inlined_call_operand.vmem [shape: f32[1,32], index: 2, kind: input, shape index: {}]   ;;  %s726_s3 = inlined_call_operand.vmem [shape: f32[32,32], index: 3, kind: input, shape index: {}]   ;;  %s727_s4 = inlined_call_operand.vmem [shape: f32[1,32], index: 4, kind: input, shape index: {}]   ;;  %s728_s5 = inlined_call_operand.vmem [shape: f32[32,4], index: 5, kind: input, shape index: {}]   ;;  %s729_s6 = inlined_call_operand.vmem [shape: f32[1,4], index: 6, kind: input, shape index: {}]   ;;  %s730_s7 = inlined_call_operand.vmem [shape: f32[48,128], index: 7, kind: output, shape index: {}]  }
   0x1 LB: > { %s541_s25 = sadd.s32 4294967295, %s595_s24   ;;  %p545_p0 = scmp.ge.s32.totalorder %s595_s24, 1  ;;  %s595_s24 = sphi %s637_s24, %s17_s24  }
   0x2   : > { %p238_p1 = scmp.lt.s32.totalorder %s595_s24, 3 }
   0x4   : > { %p239_p2 = pnand %p545_p0, %p238_p1 }
   0x5   : > { %s270_s30 = smul.u32 (!%p239_p2), 3, %s541_s25 }
   0x6   : > { %242 = sbr.rel (%p239_p2) target bundleno = 459 (0x1cb), region = 48 }
   0x7   : > { %p271_p3 = scmp.lt.s32.totalorder (!%p239_p2), %s270_s30, 5 }
   0xb   : > { %v288_v0 = vld [vmem:[%s724_s1 + $0x18] sm:$0xff]  ;;  %v287_v1 = vld [vmem:[%s724_s1 + $0x10] sm:$0xff]  ;;  %v286_v3 = vld [vmem:[%s724_s1 + $0x8] sm:$0xff]  ;;  %s732_s30 = smov (!%p271_p3, %s270_s30), 5  ;;  %vm293_vm0 = vcmask 261120   ;;  %vm478_vm4 = vcmask 31744  }
   0xc   : > { %315 = vmatpush.msra.mxu0 %v288_v0  ;;  %562 = vmatpush.msra.mxu3 %v288_v0  ;;  %v335_v2 = vld [vmem:[%s726_s3 + $0x18] sm:$0xff]  ;;  %v285_v4 = vld [vmem:[%s724_s1] sm:$0xff]  ;;  %s546_s14 = sshll.u32 %s732_s30, 3  ;;  %v334_v8 = vld [vmem:[%s726_s3 + $0x10] sm:$0xff] }
   0xd   : > { %361 = vmatpush.msra.mxu1 %v335_v2  ;;  %s274_s17 = scalar_lea.vmem %s723_s0, %s546_s14  ;;  %v333_v9 = vld [vmem:[%s726_s3 + $0x8] sm:$0xff]  ;;  %v332_v10 = vld [vmem:[%s726_s3] sm:$0xff]  ;;  %v381_v11 = vld [vmem:[%s728_s5 + $0x18] sm:$0xff]  ;;  %s712_s20 = scalar_lea.vmem %s730_s7, %s546_s14 }
   0xe   : > { %316 = vmatpush.msra.mxu0 %v287_v1  ;;  %563 = vmatpush.msra.mxu3 %v287_v1  ;;  %v282_v5 = vld [vmem:[%s274_s17] sm:$0xff]  ;;  %v283_v6 = vld [vmem:[%s274_s17 + $0x8] sm:$0xff]  ;;  %v284_v7 = vld [vmem:[%s274_s17 + $0x10] sm:$0xff] }
   0xf   : > { %362 = vmatpush.msra.mxu1 %v334_v8  ;;  %407 = vmatpush.msra.mxu2 %v381_v11  ;;  %v574_v12 = vld [vmem:[%s725_s2] ss:$0 sm:$0xff]  ;;  %v380_v22 = vld [vmem:[%s728_s5 + $0x10] sm:$0xff]  ;;  %v379_v23 = vld [vmem:[%s728_s5 + $0x8] sm:$0xff] }
  0x10   : > { %317 = vmatpush.msra.mxu0 %v286_v3  ;;  %564 = vmatpush.msra.mxu3 %v286_v3  ;;  %v378_v24 = vld [vmem:[%s728_s5] sm:$0xff] }
  0x11   : > { %363 = vmatpush.msra.mxu1 %v333_v9  ;;  %408 = vmatpush.msra.mxu2 %v380_v22  ;;  %v575_v25 = vld [vmem:[%s727_s4] ss:$0 sm:$0xff] }
  0x12   : > { %318 = vmatpush.msra.mxu0 %v285_v4  ;;  %565 = vmatpush.msra.mxu3 %v285_v4  ;;  %v576_v35 = vld [vmem:[%s729_s6] ss:$0 sm:$0xff] }
  0x13   : > { %548 = vmatmul.msk.f32.vlgmr.msra.gmra.mxu0 %vm293_vm0, %v282_v5  ;;  %549 = vmatmul.msk.f32.vlgmr.msra.gmra.mxu3 %vm293_vm0, %v283_v6 }
  0x14   : > { %364 = vmatpush.msra.mxu1 %v332_v10  ;;  %409 = vmatpush.msra.mxu2 %v379_v23 }
  0x16   : > { %410 = vmatpush.msra.mxu2 %v378_v24 }
  0x1b   : > { %550 = vmatmul.msk.f32.gmra.mxu3 %vm293_vm0, %v284_v7 }
  0x90   : > { %v320_v13 = vpop.f32.mrf.mxu0 }
  0x91   : > { %v321_v14 = vadd.f32 %v574_v12, %v320_v13 }
  0x93   : > { %v329_v15 = vmax.f32 %v321_v14, 0.0 }
  0x95   : > { %551 = vmatmul.msk.f32.vlgmr.msra.gmra.mxu1 %vm293_vm0, %v329_v15 }
  0x96   : > { %v323_v16 = vpop.f32.mrf.mxu3 }
  0x97   : > { %v324_v17 = vadd.f32 %v574_v12, %v323_v16 }
  0x99   : > { %v330_v18 = vmax.f32 %v324_v17, 0.0 }
  0x9d   : > { %552 = vmatmul.msk.f32.gmra.mxu1 %vm293_vm0, %v330_v18 }
  0x9e   : > { %v326_v19 = vpop.f32.mrf.mxu3 }
  0x9f   : > { %v327_v20 = vadd.f32 %v574_v12, %v326_v19 }
  0xa1   : > { %v331_v21 = vmax.f32 %v327_v20, 0.0 }
  0xa5   : > { %553 = vmatmul.msk.f32.gmra.mxu1 %vm293_vm0, %v331_v21 }
 0x112   : > { %v366_v26 = vpop.f32.mrf.mxu1 }
 0x113   : > { %v367_v27 = vadd.f32 %v575_v25, %v366_v26 }
 0x115   : > { %v375_v28 = vmax.f32 %v367_v27, 0.0 }
 0x117   : > { %554 = vmatmul.msk.f32.vlgmr.msra.gmra.mxu2 %vm293_vm0, %v375_v28 }
 0x11a   : > { %v369_v29 = vpop.f32.mrf.mxu1 }
 0x11b   : > { %v370_v30 = vadd.f32 %v575_v25, %v369_v29 }
 0x11d   : > { %v376_v31 = vmax.f32 %v370_v30, 0.0 }
 0x11f   : > { %555 = vmatmul.msk.f32.gmra.mxu2 %vm293_vm0, %v376_v31 }
 0x122   : > { %v372_v32 = vpop.f32.mrf.mxu1 }
 0x123   : > { %v373_v33 = vadd.f32 %v575_v25, %v372_v32 }
 0x125   : > { %v377_v34 = vmax.f32 %v373_v33, 0.0 }
 0x127   : > { %556 = vmatmul.msk.f32.gmra.mxu2 %vm293_vm0, %v377_v34 }
 0x19a   : > { %v412_v36 = vpop.f32.mrf.mxu2 }
 0x19b   : > { %v413_v37 = vadd.f32 %v576_v35, %v412_v36 }
 0x19d   : > { %v557_v38 = vmul.f32 -1.442695, %v413_v37 }
 0x19f   : > { %577 = vpow2.f32 %v557_v38 }
 0x1a2   : > { %v415_v39 = vpop.f32.mrf.mxu2 }
 0x1a3   : > { %v416_v40 = vadd.f32 %v576_v35, %v415_v39 }
 0x1a5   : > { %v578_v41 = vpop.eup %577  ;;  %v558_v42 = vmul.f32 -1.442695, %v416_v40 }
 0x1a6   : > { %v430_v43 = vadd.f32 1.0, %v578_v41 }
 0x1a7   : > { %579 = vpow2.f32 %v558_v42 }
 0x1a8   : > { %581 = vrcp.f32 %v430_v43  ;;  %v444_v52 = vand.u32 2147483648, %v430_v43  ;;  %v442_v54 = vand.u32 2147483647, %v430_v43  ;;  %vm438_vm2 = vweird.f32 %v430_v43 }
 0x1aa   : > { %v418_v44 = vpop.f32.mrf.mxu2  ;;  %v445_v58 = vor.u32 1.1754944e-38, %v444_v52  ;;  %vm443_vm5 = vcmp.eq.f32.partialorder %v442_v54, 8.507059e+37 }
 0x1ab   : > { %v419_v45 = vadd.f32 %v576_v35, %v418_v44 }
 0x1ad   : > { %v580_v46 = vpop.eup %579  ;;  %v559_v47 = vmul.f32 -1.442695, %v419_v45 }
 0x1ae   : > { %v582_v48 = vpop.eup %581  ;;  %v431_v49 = vadd.f32 1.0, %v580_v46 }
 0x1af   : > { %v434_v50 = vmul.f32 %v582_v48, %v430_v43  ;;  %583 = vpow2.f32 %v559_v47  ;;  %vm439_vm1 = vweird.f32 %v582_v48 }
 0x1b0   : > { %585 = vrcp.f32 %v431_v49  ;;  %vm440_vm3 = vmor %vm438_vm2, %vm439_vm1  ;;  %v459_v1 = vand.u32 2147483648, %v431_v49  ;;  %v457_v3 = vand.u32 2147483647, %v431_v49  ;;  %vm453_vm7 = vweird.f32 %v431_v49 }
 0x1b1   : > { %v435_v51 = vsub.f32 1.0, %v434_v50 }
 0x1b2   : > { %v460_v6 = vor.u32 1.1754944e-38, %v459_v1  ;;  %vm458_vm9 = vcmp.eq.f32.partialorder %v457_v3, 8.507059e+37 }
 0x1b3   : > { %v436_v53 = vmul.f32 %v582_v48, %v435_v51 }
 0x1b5   : > { %v584_v55 = vpop.eup %583  ;;  %v437_v56 = vadd.f32 %v582_v48, %v436_v53 }
 0x1b6   : > { %v586_v57 = vpop.eup %585  ;;  %v432_v59 = vadd.f32 1.0, %v584_v55 }
 0x1b7   : > { %v441_v60 = vsel %vm440_vm3, %v582_v48, %v437_v56  ;;  %v449_v61 = vmul.f32 %v586_v57, %v431_v49  ;;  %vm454_vm6 = vweird.f32 %v586_v57 }
 0x1b8   : > { %v446_v62 = vsel %vm443_vm5, %v445_v58, %v441_v60  ;;  %587 = vrcp.f32 %v432_v59  ;;  %vm455_vm8 = vmor %vm453_vm7, %vm454_vm6  ;;  %v474_v12 = vand.u32 2147483648, %v432_v59  ;;  %v472_v14 = vand.u32 2147483647, %v432_v59 }
 0x1b9   : > { %v479_v63 = vsel %vm478_vm4, %v446_v62, 0.0  ;;  %v450_v0 = vsub.f32 1.0, %v449_v61  ;;  %vm468_vm11 = vweird.f32 %v432_v59 }
 0x1ba   : > { %482 = vst [vmem:[%s712_s20] sm:$0xff] %v479_v63  ;;  %v475_v16 = vor.u32 1.1754944e-38, %v474_v12  ;;  %vm473_vm13 = vcmp.eq.f32.partialorder %v472_v14, 8.507059e+37 }
 0x1bb   : > { %v451_v2 = vmul.f32 %v586_v57, %v450_v0 }
 0x1bd   : > { %v452_v4 = vadd.f32 %v586_v57, %v451_v2 }
 0x1be   : > { %v588_v5 = vpop.eup %587 }
 0x1bf   : > { %v456_v7 = vsel %vm455_vm8, %v586_v57, %v452_v4  ;;  %v464_v8 = vmul.f32 %v588_v5, %v432_v59  ;;  %vm469_vm10 = vweird.f32 %v588_v5 }
 0x1c0   : > { %v461_v9 = vsel %vm458_vm9, %v460_v6, %v456_v7  ;;  %vm470_vm12 = vmor %vm468_vm11, %vm469_vm10 }
 0x1c1   : > { %v480_v10 = vsel %vm478_vm4, %v461_v9, 0.0  ;;  %v465_v11 = vsub.f32 1.0, %v464_v8 }
 0x1c2   : > { %483 = vst [vmem:[%s712_s20 + $0x8] sm:$0xff] %v480_v10 }
 0x1c3   : > { %v466_v13 = vmul.f32 %v588_v5, %v465_v11 }
 0x1c5   : > { %v467_v15 = vadd.f32 %v588_v5, %v466_v13 }
 0x1c7   : > { %v471_v17 = vsel %vm470_vm12, %v588_v5, %v467_v15 }
 0x1c8   : > { %v476_v18 = vsel %vm473_vm13, %v475_v16, %v471_v17 }
 0x1c9   : > { %v481_v19 = vsel %vm478_vm4, %v476_v18, 0.0 }
 0x1ca   : > { %484 = vst [vmem:[%s712_s20 + $0x10] sm:$0xff] %v481_v19 }
 0x1cb PF: > { %s17_s24 = sadd.s32 1, %s595_s24  }
 0x1cc   : > { %p14_p4 = scmp.ge.s32.totalorder %s17_s24, 4  }
 0x1ce   :  { %16 = sbr.rel (!%p14_p4) target bundleno = 1 (0x1), region = 78 }

</bundles_post_ra>
